<compile_context>
chip_gen: v6e
topology: v6e:2x2x1
jax: 0.10.0
libtpu: 0.0.40
codegen_flags: <defaults>
</compile_context>

<pallas_src>
import jax
import jax.numpy as jnp
from jax.experimental import pallas as pl
from jax.experimental.pallas import tpu as pltpu

NEG_SLOPE = 0.01  # nn.LeakyReLU default

D_IN, D_H1, D_H2, D_H3, D_OUT, D_OUT_PAD = 784, 512, 256, 128, 10, 128


def _round_up(n, m):
    return ((n + m - 1) // m) * m


def _cdiv(a, b):
    return -(-a // b)


def _leaky_relu(h):
    return jnp.where(h > 0, h, NEG_SLOPE * h)


def mlp_kernel(x_ref, w1_ref, b1_ref, w2_ref, b2_ref, w3_ref, b3_ref,
               w4_ref, b4_ref, o_ref):
    # Layer 1: (TM,784)bf16 @ (784,512)bf16 -> f32 acc.
    # astype is a no-op when x is already bf16 (preferred path).
    h = jnp.dot(x_ref[...].astype(jnp.bfloat16), w1_ref[...],
                preferred_element_type=jnp.float32)
    h = _leaky_relu(h + b1_ref[...])
    # Layer 2: (TM,512) @ (512,256)
    h = jnp.dot(h.astype(jnp.bfloat16), w2_ref[...],
                preferred_element_type=jnp.float32)
    h = _leaky_relu(h + b2_ref[...])
    # Layer 3: (TM,256) @ (256,128)
    h = jnp.dot(h.astype(jnp.bfloat16), w3_ref[...],
                preferred_element_type=jnp.float32)
    h = _leaky_relu(h + b3_ref[...])
    # Output layer (padded to 128 lanes): (TM,128) @ (128,128)
    logits = jnp.dot(h.astype(jnp.bfloat16), w4_ref[...],
                     preferred_element_type=jnp.float32)
    logits = logits + b4_ref[...]
    # log_softmax over last axis, f32 (padded lanes have bias=-1e30 -> exp==0)
    m = jnp.max(logits, axis=-1, keepdims=True)
    lse = jnp.log(jnp.sum(jnp.exp(logits - m), axis=-1, keepdims=True)) + m
    o_ref[...] = logits - lse


def prepare_params(params):
    """One-time prep: transpose to (in,out), pad final layer to 128 lanes,
    cast weights to bf16. Do NOT call this inside the per-step forward."""
    w1, b1, w2, b2, w3, b3, w4, b4 = params
    w1t = w1.T.astype(jnp.bfloat16)
    w2t = w2.T.astype(jnp.bfloat16)
    w3t = w3.T.astype(jnp.bfloat16)
    w4t = (jnp.zeros((D_H3, D_OUT_PAD), jnp.float32)
           .at[:, :D_OUT].set(w4.T)).astype(jnp.bfloat16)
    b4p = jnp.full((1, D_OUT_PAD), -1e30, jnp.float32).at[0, :D_OUT].set(b4)
    return (w1t, b1.reshape(1, -1).astype(jnp.float32),
            w2t, b2.reshape(1, -1).astype(jnp.float32),
            w3t, b3.reshape(1, -1).astype(jnp.float32),
            w4t, b4p)


def _tile_config():
    """(TM_max, want_multi_tile) per TPU generation.

    v5e: compute-bound (197 TF/s) and 16 MiB default scoped VMEM -> TM 256.
    v6e: HBM-bound on the x stream -> bigger tiles amortize step overhead.
    v7x: 2 TensorCores/chip -> prefer >=2 (even) tiles over maximal TM.
    """
    kind = ""
    try:
        kind = jax.devices()[0].device_kind.lower()
    except Exception:  # pragma: no cover - conservative fallback
        pass
    if "v5" in kind:
        return 256, False
    if "v7" in kind:
        return 1024, True
    return 512, False  # v6e / unknown default


def _choose_tiling(B):
    """Pick (TM, num_tiles) minimizing batch padding, honoring per-chip TM_max
    and v7x's preference for an even number of tiles (2-TC sharding)."""
    tm_max, want_multi = _tile_config()
    if B <= tm_max and not (want_multi and B > 16):
        return _round_up(B, 8), 1
    num_tiles = _cdiv(B, tm_max)
    if want_multi and B > 16:
        num_tiles = max(num_tiles, 2)
        if num_tiles % 2 == 1:
            num_tiles += 1  # even tile count -> both v7x TensorCores busy
    tm = _round_up(_cdiv(B, num_tiles), 8)
    return tm, num_tiles


def net_forward(x, prepared):
    """x: (B, 1, 28, 28) float32 or bfloat16 NCHW (bf16 preferred: it halves
    the dominant HBM stream on v6e/v7x).  prepared: output of prepare_params.
    Returns (B, 10) float32 log-probabilities."""
    w1t, b1, w2t, b2, w3t, b3, w4t, b4p = prepared
    B = x.shape[0]
    # data.view(-1, 784); keep the caller's dtype (no wrapper-side astype,
    # which would be a separate XLA pass re-reading x).
    x2d = x.reshape(B, D_IN)

    TM, num_tiles = _choose_tiling(B)
    Bp = TM * num_tiles
    if Bp != B:
        x2d = jnp.pad(x2d, ((0, Bp - B), (0, 0)))
    grid = (num_tiles,)

    # x / out stream per batch tile; weights & biases have constant block
    # indices so they are fetched once and stay resident in VMEM.
    # (If profiling shows exposed x DMA, add pipeline_mode=pl.Buffered(3) to
    #  the x BlockSpec only.)
    const = lambda shape: pl.BlockSpec(shape, lambda i: (0, 0))
    in_specs = [
        pl.BlockSpec((TM, D_IN), lambda i: (i, 0)),        # x tile (streamed)
        const((D_IN, D_H1)), const((1, D_H1)),             # w1t, b1
        const((D_H1, D_H2)), const((1, D_H2)),             # w2t, b2
        const((D_H2, D_H3)), const((1, D_H3)),             # w3t, b3
        const((D_H3, D_OUT_PAD)), const((1, D_OUT_PAD)),   # w4t, b4p
    ]
    out_specs = pl.BlockSpec((TM, D_OUT_PAD), lambda i: (i, 0))

    x_bytes = x2d.dtype.itemsize
    flops = 2 * Bp * (D_IN * D_H1 + D_H1 * D_H2 + D_H2 * D_H3
                      + D_H3 * D_OUT_PAD)
    weight_bytes = 2 * (D_IN * D_H1 + D_H1 * D_H2 + D_H2 * D_H3
                        + D_H3 * D_OUT_PAD)  # bf16
    bytes_accessed = x_bytes * Bp * D_IN + weight_bytes + 4 * Bp * D_OUT_PAD

    out = pl.pallas_call(
        mlp_kernel,
        out_shape=jax.ShapeDtypeStruct((Bp, D_OUT_PAD), jnp.float32),
        grid=grid,
        in_specs=in_specs,
        out_specs=out_specs,
        compiler_params=pltpu.CompilerParams(
            dimension_semantics=("parallel",)),
        cost_estimate=pl.CostEstimate(
            flops=flops,
            bytes_accessed=bytes_accessed,
            transcendentals=Bp * (D_OUT_PAD + 1)),
    )(x2d, w1t, b1, w2t, b2, w3t, b3, w4t, b4p)
    return out[:B, :D_OUT]


def init_params(key):
    """Deterministic init mirroring nn.Linear default (U(-1/sqrt(fan_in),...)).
    Weights are stored PyTorch-style as (out_features, in_features)."""
    dims = [(D_IN, D_H1), (D_H1, D_H2), (D_H2, D_H3), (D_H3, D_OUT)]
    params = []
    for (fan_in, fan_out) in dims:
        key, kw, kb = jax.random.split(key, 3)
        bound = 1.0 / jnp.sqrt(jnp.float32(fan_in))
        w = jax.random.uniform(kw, (fan_out, fan_in), jnp.float32, -bound, bound)
        b = jax.random.uniform(kb, (fan_out,), jnp.float32, -bound, bound)
        params += [w, b]
    return tuple(params)


def reference_forward(x, params):
    """Pure-JAX f32 reference of the PyTorch forward."""
    w1, b1, w2, b2, w3, b3, w4, b4 = params
    h = x.reshape(x.shape[0], D_IN).astype(jnp.float32)
    h = _leaky_relu(h @ w1.T + b1)
    h = _leaky_relu(h @ w2.T + b2)
    h = _leaky_relu(h @ w3.T + b3)
    logits = h @ w4.T + b4
    return jax.nn.log_softmax(logits, axis=1)


if __name__ == "__main__":
    key = jax.random.PRNGKey(0)
    kx, kp = jax.random.split(key)
    B = 8
    x_f32 = jax.random.normal(kx, (B, 1, 28, 28), jnp.float32)  # NCHW, MNIST-shaped
    # "Data-loader" side bf16 cast (per perf review): the kernel consumes bf16
    # directly, halving the dominant x HBM stream on v6e/v7x.
    x = x_f32.astype(jnp.bfloat16)

    params = init_params(kp)
    prepared = prepare_params(params)  # one-time transpose / pad / bf16 cast

    fwd = jax.jit(net_forward)
    out = fwd(x, prepared)
    out = jax.block_until_ready(out)

    # Reference sees the same bf16-quantized input (cast back to f32), so the
    # only remaining error is bf16 matmul rounding vs f32 accumulation.
    ref = reference_forward(x, params)
    assert out.shape == (B, D_OUT)
    assert jnp.allclose(out, ref, atol=2e-2, rtol=2e-2), "mismatch vs JAX reference"
    print("KERNEL_OK")
</pallas_src>

<mosaic_0001>
module attributes {stable_mosaic.version = 11 : i64} {
  func.func @mlp_kernel(%arg0: i32, %arg1: memref<8x784xbf16, #tpu.memory_space<vmem>>, %arg2: memref<784x512xbf16, #tpu.memory_space<vmem>>, %arg3: memref<1x512xf32, #tpu.memory_space<vmem>>, %arg4: memref<512x256xbf16, #tpu.memory_space<vmem>>, %arg5: memref<1x256xf32, #tpu.memory_space<vmem>>, %arg6: memref<256x128xbf16, #tpu.memory_space<vmem>>, %arg7: memref<1x128xf32, #tpu.memory_space<vmem>>, %arg8: memref<128x128xbf16, #tpu.memory_space<vmem>>, %arg9: memref<1x128xf32, #tpu.memory_space<vmem>>, %arg10: memref<8x128xf32, #tpu.memory_space<vmem>>) attributes {dimension_semantics = [#tpu.dimension_semantics<parallel>], iteration_bounds = array<i64: 1>, scalar_prefetch = 0 : i64, scratch_operands = 0 : i64, tpu.core_type = #tpu.core_type<tc>, window_params = [{transform_indices = @transform_0, window_bounds = array<i64: 8, 784>}, {pipeline_mode = #tpu.pipeline_mode<synchronous>, transform_indices = @transform_1, window_bounds = array<i64: 784, 512>}, {pipeline_mode = #tpu.pipeline_mode<synchronous>, transform_indices = @transform_2, window_bounds = array<i64: 1, 512>}, {pipeline_mode = #tpu.pipeline_mode<synchronous>, transform_indices = @transform_3, window_bounds = array<i64: 512, 256>}, {pipeline_mode = #tpu.pipeline_mode<synchronous>, transform_indices = @transform_4, window_bounds = array<i64: 1, 256>}, {pipeline_mode = #tpu.pipeline_mode<synchronous>, transform_indices = @transform_5, window_bounds = array<i64: 256, 128>}, {pipeline_mode = #tpu.pipeline_mode<synchronous>, transform_indices = @transform_6, window_bounds = array<i64: 1, 128>}, {pipeline_mode = #tpu.pipeline_mode<synchronous>, transform_indices = @transform_7, window_bounds = array<i64: 128, 128>}, {pipeline_mode = #tpu.pipeline_mode<synchronous>, transform_indices = @transform_8, window_bounds = array<i64: 1, 128>}, {transform_indices = @transform_9, window_bounds = array<i64: 8, 128>}]} {
    %c0 = arith.constant 0 : index
    %c0_0 = arith.constant 0 : index
    %0 = vector.load %arg1[%c0, %c0_0] : memref<8x784xbf16, #tpu.memory_space<vmem>>, vector<8x784xbf16>
    %c0_1 = arith.constant 0 : index
    %c0_2 = arith.constant 0 : index
    %1 = vector.load %arg2[%c0_1, %c0_2] : memref<784x512xbf16, #tpu.memory_space<vmem>>, vector<784x512xbf16>
    %cst = arith.constant dense<0.000000e+00> : vector<8x512xf32>
    %2 = tpu.matmul %0, %1, %cst {dimension_numbers = #tpu.dot_dimension_numbers<[1], [0], [0], [1], [0, 0, 1, 1], [], []>} : vector<8x784xbf16>, vector<784x512xbf16>, vector<8x512xf32> -> vector<8x512xf32>
    %c0_3 = arith.constant 0 : index
    %c0_4 = arith.constant 0 : index
    %3 = vector.load %arg3[%c0_3, %c0_4] : memref<1x512xf32, #tpu.memory_space<vmem>>, vector<1x512xf32>
    %4 = vector.broadcast %3 : vector<1x512xf32> to vector<8x512xf32>
    %5 = arith.addf %2, %4 : vector<8x512xf32>
    %cst_5 = arith.constant 0.000000e+00 : f32
    %6 = vector.broadcast %cst_5 : f32 to vector<8x512xf32>
    %7 = arith.cmpf ogt, %5, %6 : vector<8x512xf32>
    %cst_6 = arith.constant 0.00999999977 : f32
    %8 = vector.broadcast %cst_6 : f32 to vector<8x512xf32>
    %9 = arith.mulf %8, %5 : vector<8x512xf32>
    %10 = arith.select %7, %5, %9 : vector<8x512xi1>, vector<8x512xf32>
    %11 = arith.truncf %10 : vector<8x512xf32> to vector<8x512xbf16>
    %c0_7 = arith.constant 0 : index
    %c0_8 = arith.constant 0 : index
    %12 = vector.load %arg4[%c0_7, %c0_8] : memref<512x256xbf16, #tpu.memory_space<vmem>>, vector<512x256xbf16>
    %cst_9 = arith.constant dense<0.000000e+00> : vector<8x256xf32>
    %13 = tpu.matmul %11, %12, %cst_9 {dimension_numbers = #tpu.dot_dimension_numbers<[1], [0], [0], [1], [0, 0, 1, 1], [], []>} : vector<8x512xbf16>, vector<512x256xbf16>, vector<8x256xf32> -> vector<8x256xf32>
    %c0_10 = arith.constant 0 : index
    %c0_11 = arith.constant 0 : index
    %14 = vector.load %arg5[%c0_10, %c0_11] : memref<1x256xf32, #tpu.memory_space<vmem>>, vector<1x256xf32>
    %15 = vector.broadcast %14 : vector<1x256xf32> to vector<8x256xf32>
    %16 = arith.addf %13, %15 : vector<8x256xf32>
    %cst_12 = arith.constant 0.000000e+00 : f32
    %17 = vector.broadcast %cst_12 : f32 to vector<8x256xf32>
    %18 = arith.cmpf ogt, %16, %17 : vector<8x256xf32>
    %cst_13 = arith.constant 0.00999999977 : f32
    %19 = vector.broadcast %cst_13 : f32 to vector<8x256xf32>
    %20 = arith.mulf %19, %16 : vector<8x256xf32>
    %21 = arith.select %18, %16, %20 : vector<8x256xi1>, vector<8x256xf32>
    %22 = arith.truncf %21 : vector<8x256xf32> to vector<8x256xbf16>
    %c0_14 = arith.constant 0 : index
    %c0_15 = arith.constant 0 : index
    %23 = vector.load %arg6[%c0_14, %c0_15] : memref<256x128xbf16, #tpu.memory_space<vmem>>, vector<256x128xbf16>
    %cst_16 = arith.constant dense<0.000000e+00> : vector<8x128xf32>
    %24 = tpu.matmul %22, %23, %cst_16 {dimension_numbers = #tpu.dot_dimension_numbers<[1], [0], [0], [1], [0, 0, 1, 1], [], []>} : vector<8x256xbf16>, vector<256x128xbf16>, vector<8x128xf32> -> vector<8x128xf32>
    %c0_17 = arith.constant 0 : index
    %c0_18 = arith.constant 0 : index
    %25 = vector.load %arg7[%c0_17, %c0_18] : memref<1x128xf32, #tpu.memory_space<vmem>>, vector<1x128xf32>
    %26 = vector.broadcast %25 : vector<1x128xf32> to vector<8x128xf32>
    %27 = arith.addf %24, %26 : vector<8x128xf32>
    %cst_19 = arith.constant 0.000000e+00 : f32
    %28 = vector.broadcast %cst_19 : f32 to vector<8x128xf32>
    %29 = arith.cmpf ogt, %27, %28 : vector<8x128xf32>
    %cst_20 = arith.constant 0.00999999977 : f32
    %30 = vector.broadcast %cst_20 : f32 to vector<8x128xf32>
    %31 = arith.mulf %30, %27 : vector<8x128xf32>
    %32 = arith.select %29, %27, %31 : vector<8x128xi1>, vector<8x128xf32>
    %33 = arith.truncf %32 : vector<8x128xf32> to vector<8x128xbf16>
    %c0_21 = arith.constant 0 : index
    %c0_22 = arith.constant 0 : index
    %34 = vector.load %arg8[%c0_21, %c0_22] : memref<128x128xbf16, #tpu.memory_space<vmem>>, vector<128x128xbf16>
    %cst_23 = arith.constant dense<0.000000e+00> : vector<8x128xf32>
    %35 = tpu.matmul %33, %34, %cst_23 {dimension_numbers = #tpu.dot_dimension_numbers<[1], [0], [0], [1], [0, 0, 1, 1], [], []>} : vector<8x128xbf16>, vector<128x128xbf16>, vector<8x128xf32> -> vector<8x128xf32>
    %c0_24 = arith.constant 0 : index
    %c0_25 = arith.constant 0 : index
    %36 = vector.load %arg9[%c0_24, %c0_25] : memref<1x128xf32, #tpu.memory_space<vmem>>, vector<1x128xf32>
    %37 = vector.broadcast %36 : vector<1x128xf32> to vector<8x128xf32>
    %38 = arith.addf %35, %37 : vector<8x128xf32>
    %cst_26 = arith.constant dense<0xFF800000> : vector<8xf32>
    %39 = vector.multi_reduction <maximumf>, %38, %cst_26 [1] : vector<8x128xf32> to vector<8xf32>
    %40 = vector.shape_cast %39 : vector<8xf32> to vector<8x1xf32>
    %41 = vector.broadcast %40 : vector<8x1xf32> to vector<8x128xf32>
    %42 = arith.subf %38, %41 : vector<8x128xf32>
    %43 = math.exp %42 : vector<8x128xf32>
    %cst_27 = arith.constant dense<0.000000e+00> : vector<8xf32>
    %44 = vector.multi_reduction <add>, %43, %cst_27 [1] : vector<8x128xf32> to vector<8xf32>
    %45 = vector.shape_cast %44 : vector<8xf32> to vector<8x1xf32>
    %46 = math.log %45 : vector<8x1xf32>
    %47 = arith.addf %46, %40 : vector<8x1xf32>
    %48 = vector.broadcast %47 : vector<8x1xf32> to vector<8x128xf32>
    %49 = arith.subf %38, %48 : vector<8x128xf32>
    %c0_28 = arith.constant 0 : index
    %c0_29 = arith.constant 0 : index
    %50 = vector.load %arg10[%c0_28, %c0_29] : memref<8x128xf32, #tpu.memory_space<vmem>>, vector<8x128xf32>
    tpu.vector_store %arg10[%c0_28, %c0_29], %49 {strides = array<i32>} : memref<8x128xf32, #tpu.memory_space<vmem>>, vector<8x128xf32>,
    return
  }
  func.func @transform_0(%arg0: i32) -> (i32, i32) {
    %c0_i32 = arith.constant 0 : i32
    %c0_i32_0 = arith.constant 0 : i32
    return %arg0, %c0_i32 : i32, i32
  }
  func.func @transform_1(%arg0: i32) -> (i32, i32) {
    %c0_i32 = arith.constant 0 : i32
    %c0_i32_0 = arith.constant 0 : i32
    %c0_i32_1 = arith.constant 0 : i32
    return %c0_i32, %c0_i32_0 : i32, i32
  }
  func.func @transform_2(%arg0: i32) -> (i32, i32) {
    %c0_i32 = arith.constant 0 : i32
    %c0_i32_0 = arith.constant 0 : i32
    %c0_i32_1 = arith.constant 0 : i32
    return %c0_i32, %c0_i32_0 : i32, i32
  }
  func.func @transform_3(%arg0: i32) -> (i32, i32) {
    %c0_i32 = arith.constant 0 : i32
    %c0_i32_0 = arith.constant 0 : i32
    %c0_i32_1 = arith.constant 0 : i32
    return %c0_i32, %c0_i32_0 : i32, i32
  }
  func.func @transform_4(%arg0: i32) -> (i32, i32) {
    %c0_i32 = arith.constant 0 : i32
    %c0_i32_0 = arith.constant 0 : i32
    %c0_i32_1 = arith.constant 0 : i32
    return %c0_i32, %c0_i32_0 : i32, i32
  }
  func.func @transform_5(%arg0: i32) -> (i32, i32) {
    %c0_i32 = arith.constant 0 : i32
    %c0_i32_0 = arith.constant 0 : i32
    %c0_i32_1 = arith.constant 0 : i32
    return %c0_i32, %c0_i32_0 : i32, i32
  }
  func.func @transform_6(%arg0: i32) -> (i32, i32) {
    %c0_i32 = arith.constant 0 : i32
    %c0_i32_0 = arith.constant 0 : i32
    %c0_i32_1 = arith.constant 0 : i32
    return %c0_i32, %c0_i32_0 : i32, i32
  }
  func.func @transform_7(%arg0: i32) -> (i32, i32) {
    %c0_i32 = arith.constant 0 : i32
    %c0_i32_0 = arith.constant 0 : i32
    %c0_i32_1 = arith.constant 0 : i32
    return %c0_i32, %c0_i32_0 : i32, i32
  }
  func.func @transform_8(%arg0: i32) -> (i32, i32) {
    %c0_i32 = arith.constant 0 : i32
    %c0_i32_0 = arith.constant 0 : i32
    %c0_i32_1 = arith.constant 0 : i32
    return %c0_i32, %c0_i32_0 : i32, i32
  }
  func.func @transform_9(%arg0: i32) -> (i32, i32) {
    %c0_i32 = arith.constant 0 : i32
    %c0_i32_0 = arith.constant 0 : i32
    return %arg0, %c0_i32 : i32, i32
  }
}

</mosaic_0001>

<bundles_post_ra>
// kernel: net_forward.1
= control target key start
LH: loop header
LB: loop body
LE: loop exit
PB: predicated region body
PF: predicated region fallthrough
CT: control target
= control target key end

     0   :  { %14 = vsyncpa [#allocation3], 0  ;;  %s3504_s0 = inlined_call_operand.vmem [shape: bf16[8,784], index: 0, kind: input, shape index: {}]   ;;  %s3505_s1 = inlined_call_operand.hbm [shape: bf16[784,512], index: 1, kind: input, shape index: {}]   ;;  %s3506_s2 = inlined_call_operand.vmem [shape: f32[1,512], index: 2, kind: input, shape index: {}]   ;;  %s3507_s3 = inlined_call_operand.hbm [shape: bf16[512,256], index: 3, kind: input, shape index: {}]   ;;  %s3508_s4 = inlined_call_operand.vmem [shape: f32[1,256], index: 4, kind: input, shape index: {}]   ;;  %s3509_s5 = inlined_call_operand.vmem [shape: bf16[256,128], index: 5, kind: input, shape index: {}]   ;;  %s3510_s6 = inlined_call_operand.vmem [shape: f32[1,128], index: 6, kind: input, shape index: {}]   ;;  %s3511_s7 = inlined_call_operand.vmem [shape: bf16[128,128], index: 7, kind: input, shape index: {}]   ;;  %s3512_s8 = inlined_call_operand.vmem [shape: f32[1,128], index: 8, kind: input, shape index: {}]   ;;  %s3513_s9 = inlined_call_operand.hbm [shape: f32[8,128], index: 9, kind: output, shape index: {}]  }
   0x1   :  { %15 = vsyncpa [#allocation6], 0 }
   0x2   :  { %16 = vsyncpa [#allocation4], 0  ;;  %s3287_s30 = smov [#allocation2]  }
   0x3   :  { %s24_s10 = sshll.u32 %s3287_s30, 4  ;;  %s25_s10 = int_to_ptr.vmem [resolvable:$true] %s24_s10 }
   0x4   :  { %s3229_s11 = scalar_lea.vmem %s25_s10, 25088  ;;  %p3234_p1 = scmp.lt.s32.totalorder %s25_s10, %s25_s10 }
   0x5   :  { %p3230_p0 = scmp.ne.s32.totalorder %s25_s10, %s3229_s11  ;;  %p3235_p2 = scmp.lt.s32.totalorder %s3229_s11, %s3229_s11 }
   0x7   :  { %p3236_p3 = por %p3235_p2, %p3234_p1 }
   0x9   :  { %p3237_p4 = pnand %p3236_p3, %p3230_p0 }
   0xb   :  { %3240 = shalt.err (!%p3237_p4)
}
   0xc   :  { %s3288_s12 = smov 256   ;;  %s3289_s13 = smov 16  }
   0xd   :  { %30 = dma.hbm_to_vmem [thread:$0]  %s3505_s1, 25088, %s25_s10, [#allocation3], %s3288_s12, %s3288_s12, %s3289_s13  }
   0xe   :  { %s3290_s16 = smov [#allocation5]  }
   0xf   :  { %s38_s17 = sshll.u32 %s3290_s16, 4  ;;  %s39_s17 = int_to_ptr.vmem [resolvable:$true] %s38_s17 }
  0x10   :  { %s3249_s18 = scalar_lea.vmem %s39_s17, 8192  ;;  %p3254_p6 = scmp.lt.s32.totalorder %s39_s17, %s39_s17 }
  0x11   :  { %p3250_p5 = scmp.ne.s32.totalorder %s39_s17, %s3249_s18  ;;  %p3255_p7 = scmp.lt.s32.totalorder %s3249_s18, %s3249_s18 }
  0x13   :  { %p3256_p8 = por %p3255_p7, %p3254_p6 }
  0x15   :  { %p3257_p9 = pnand %p3256_p8, %p3250_p5 }
  0x17   :  { %3260 = shalt.err (!%p3257_p9)
}
  0x18   :  { %s3291_s19 = smov 128   ;;  %s3292_s20 = smov 8  }
  0x19   :  { %44 = dma.hbm_to_vmem [thread:$0]  %s3507_s3, 8192, %s39_s17, [#allocation6], %s3291_s19, %s3291_s19, %s3292_s20  }
  0x1a   :  { %3281 = dma.done.wait [#allocation3], 25088  }
  0x1b   :  { %3282 = vsyncadd [#allocation3], 4294942208 }
  0x1c   :  { %3283 = dma.done.wait [#allocation6], 8192  }
  0x1d   :  { %3284 = vsyncadd [#allocation6], 4294959104  ;;  %v2796_v0 = vld [vmem:[#allocation2 + $0xe4] ss:$16 sps:$4 sm:$0xff]   ;;  %v2800_v2 = vld [vmem:[#allocation2 + $0xe0] ss:$16 sps:$4 sm:$0xff]  }
  0x1e   :  { %v2798_v1 = vld [vmem:[#allocation2 + $0x2e4] ss:$16 sps:$4 sm:$0xff]   ;;  %1292 = vmatprep.subr.bf16.mxu0 %v2796_v0  ;;  %v2801_v3 = vld [vmem:[#allocation2 + $0x2e0] ss:$16 sps:$4 sm:$0xff]   ;;  %v63_v48 = vld [vmem:[%s3504_s0 + $0x8] sm:$0xff]  ;;  %vm1288_vm0 = vcmask 130048  }
  0x1f   :  { %1333 = vmatprep.subr.bf16.mxu1 %v2798_v1  ;;  %v2802_v4 = vld [vmem:[#allocation2 + $0xc4] ss:$16 sps:$4 sm:$0xff]   ;;  %1293 = vmatpush1.bf16.msra.mxu0 %v2800_v2  ;;  %v2806_v6 = vld [vmem:[#allocation2 + $0xc0] ss:$16 sps:$4 sm:$0xff]   ;;  %v3361_v51 = vcombine.high %v63_v48, %v63_v48  ;;  %vm3295_vm7 = vmmov 0  }
  0x20   :  { %1334 = vmatpush1.bf16.msra.mxu1 %v2801_v3  ;;  %v2804_v5 = vld [vmem:[#allocation2 + $0x2c4] ss:$16 sps:$4 sm:$0xff]   ;;  %1294 = vmatprep.subr.bf16.mxu0 %v2802_v4  ;;  %v2807_v7 = vld [vmem:[#allocation2 + $0x2c0] ss:$16 sps:$4 sm:$0xff]  }
  0x21   :  { %1335 = vmatprep.subr.bf16.mxu1 %v2804_v5  ;;  %v2808_v8 = vld [vmem:[#allocation2 + $0xa4] ss:$16 sps:$4 sm:$0xff]   ;;  %v2812_v10 = vld [vmem:[#allocation2 + $0xa0] ss:$16 sps:$4 sm:$0xff]   ;;  %1365 = vmatprep.mubr.bf16.mxu1 %v3361_v51 }
  0x22   :  { %v2810_v9 = vld [vmem:[#allocation2 + $0x2a4] ss:$16 sps:$4 sm:$0xff]   ;;  %v2813_v11 = vld [vmem:[#allocation2 + $0x2a0] ss:$16 sps:$4 sm:$0xff]  }
  0x23   :  { %1295 = vmatpush1.bf16.msra.mxu0 %v2806_v6  ;;  %v2814_v12 = vld [vmem:[#allocation2 + $0x84] ss:$16 sps:$4 sm:$0xff]   ;;  %v2818_v14 = vld [vmem:[#allocation2 + $0x80] ss:$16 sps:$4 sm:$0xff]  }
  0x24   :  { %1336 = vmatpush1.bf16.msra.mxu1 %v2807_v7  ;;  %1296 = vmatprep.subr.bf16.mxu0 %v2808_v8  ;;  %v2816_v13 = vld [vmem:[#allocation2 + $0x284] ss:$16 sps:$4 sm:$0xff]   ;;  %v2819_v15 = vld [vmem:[#allocation2 + $0x280] ss:$16 sps:$4 sm:$0xff]   ;;  %v3367_v7 = vcombine.low %v63_v48, %v63_v48  ;;  %v2956_v48 = vld [vmem:[#allocation2 + $0x1ec] ss:$16 sps:$4 sm:$0xff]  }
  0x25   :  { %1337 = vmatprep.subr.bf16.mxu1 %v2810_v9  ;;  %v2820_v16 = vld [vmem:[#allocation2 + $0x64] ss:$16 sps:$4 sm:$0xff]   ;;  %v2824_v18 = vld [vmem:[#allocation2 + $0x60] ss:$16 sps:$4 sm:$0xff]  }
  0x26   :  { %v2822_v17 = vld [vmem:[#allocation2 + $0x264] ss:$16 sps:$4 sm:$0xff]   ;;  %v2825_v19 = vld [vmem:[#allocation2 + $0x260] ss:$16 sps:$4 sm:$0xff]  }
  0x27   :  { %1297 = vmatpush1.bf16.msra.mxu0 %v2812_v10  ;;  %v2826_v20 = vld [vmem:[#allocation2 + $0x44] ss:$16 sps:$4 sm:$0xff]   ;;  %v2830_v22 = vld [vmem:[#allocation2 + $0x40] ss:$16 sps:$4 sm:$0xff]  }
  0x28   :  { %1338 = vmatpush1.bf16.msra.mxu1 %v2813_v11  ;;  %1298 = vmatprep.subr.bf16.mxu0 %v2814_v12  ;;  %v2828_v21 = vld [vmem:[#allocation2 + $0x244] ss:$16 sps:$4 sm:$0xff]   ;;  %v2831_v23 = vld [vmem:[#allocation2 + $0x240] ss:$16 sps:$4 sm:$0xff]   ;;  %v2907_v11 = vld [vmem:[#allocation2 + $0xec] ss:$16 sps:$4 sm:$0xff]  }
  0x29   :  { %1339 = vmatprep.subr.bf16.mxu1 %v2816_v13  ;;  %v2832_v24 = vld [vmem:[#allocation2 + $0x24] ss:$16 sps:$4 sm:$0xff]   ;;  %v2836_v26 = vld [vmem:[#allocation2 + $0x20] ss:$16 sps:$4 sm:$0xff]   ;;  %v3293_v13 = vmov 0  }
  0x2a   :  { %v2834_v25 = vld [vmem:[#allocation2 + $0x224] ss:$16 sps:$4 sm:$0xff]   ;;  %v2837_v27 = vld [vmem:[#allocation2 + $0x220] ss:$16 sps:$4 sm:$0xff]  }
  0x2b   :  { %1299 = vmatpush1.bf16.msra.mxu0 %v2818_v14  ;;  %v2838_v28 = vld [vmem:[#allocation2 + $0x4] ss:$16 sps:$4 sm:$0xff]   ;;  %v2842_v30 = vld [vmem:[#allocation2] ss:$16 sps:$4 sm:$0xff]  }
  0x2c   :  { %1340 = vmatpush1.bf16.msra.mxu1 %v2819_v15  ;;  %1300 = vmatprep.subr.bf16.mxu0 %v2820_v16  ;;  %v2840_v29 = vld [vmem:[#allocation2 + $0x204] ss:$16 sps:$4 sm:$0xff]   ;;  %v2843_v31 = vld [vmem:[#allocation2 + $0x200] ss:$16 sps:$4 sm:$0xff]   ;;  %v2905_v15 = vld [vmem:[#allocation2 + $0xe8] ss:$16 sps:$4 sm:$0xff]  }
  0x2d   :  { %1341 = vmatprep.subr.bf16.mxu1 %v2822_v17  ;;  %v2844_v32 = vld [vmem:[#allocation2 + $0x1e4] ss:$16 sps:$4 sm:$0xff]   ;;  %v2848_v34 = vld [vmem:[#allocation2 + $0x1e0] ss:$16 sps:$4 sm:$0xff]   ;;  %v3375_v17 = vld [vmem:[%s3504_s0 + $0x18] ss:$0 sps:$4 sm:$0xff]  }
  0x2e   :  { %v2846_v33 = vld [vmem:[#allocation2 + $0x3e4] ss:$16 sps:$4 sm:$0xff]   ;;  %v2849_v35 = vld [vmem:[#allocation2 + $0x3e0] ss:$16 sps:$4 sm:$0xff]  }
  0x2f   :  { %1301 = vmatpush1.bf16.msra.mxu0 %v2824_v18  ;;  %v2850_v36 = vld [vmem:[#allocation2 + $0x1c4] ss:$16 sps:$4 sm:$0xff]   ;;  %v2854_v38 = vld [vmem:[#allocation2 + $0x1c0] ss:$16 sps:$4 sm:$0xff]   ;;  %v2914_v18 = vld [vmem:[#allocation2 + $0xcc] ss:$16 sps:$4 sm:$0xff]  }
  0x30   :  { %1342 = vmatpush1.bf16.msra.mxu1 %v2825_v19  ;;  %1302 = vmatprep.subr.bf16.mxu0 %v2826_v20  ;;  %v2852_v37 = vld [vmem:[#allocation2 + $0x3c4] ss:$16 sps:$4 sm:$0xff]   ;;  %v2855_v39 = vld [vmem:[#allocation2 + $0x3c0] ss:$16 sps:$4 sm:$0xff]   ;;  %v2912_v20 = vld [vmem:[#allocation2 + $0xc8] ss:$16 sps:$4 sm:$0xff]  }
  0x31   :  { %1343 = vmatprep.subr.bf16.mxu1 %v2828_v21  ;;  %v2856_v40 = vld [vmem:[#allocation2 + $0x1a4] ss:$16 sps:$4 sm:$0xff]   ;;  %v2860_v42 = vld [vmem:[#allocation2 + $0x1a0] ss:$16 sps:$4 sm:$0xff]  }
  0x32   :  { %v2858_v41 = vld [vmem:[#allocation2 + $0x3a4] ss:$16 sps:$4 sm:$0xff]   ;;  %v2861_v43 = vld [vmem:[#allocation2 + $0x3a0] ss:$16 sps:$4 sm:$0xff]  }
  0x33   :  { %1303 = vmatpush1.bf16.msra.mxu0 %v2830_v22  ;;  %v2862_v44 = vld [vmem:[#allocation2 + $0x184] ss:$16 sps:$4 sm:$0xff]   ;;  %v2866_v49 = vld [vmem:[#allocation2 + $0x180] ss:$16 sps:$4 sm:$0xff]   ;;  %v2920_v22 = vld [vmem:[#allocation2 + $0xac] ss:$16 sps:$4 sm:$0xff]  }
  0x34   :  { %1344 = vmatpush1.bf16.msra.mxu1 %v2831_v23  ;;  %1304 = vmatprep.subr.bf16.mxu0 %v2832_v24  ;;  %v2864_v45 = vld [vmem:[#allocation2 + $0x384] ss:$16 sps:$4 sm:$0xff]   ;;  %v2867_v50 = vld [vmem:[#allocation2 + $0x380] ss:$16 sps:$4 sm:$0xff]   ;;  %v2918_v24 = vld [vmem:[#allocation2 + $0xa8] ss:$16 sps:$4 sm:$0xff]  }
  0x35   :  { %1345 = vmatprep.subr.bf16.mxu1 %v2834_v25  ;;  %v62_v46 = vld [vmem:[%s3504_s0] sm:$0xff] }
  0x36   :  { %v3356_v47 = vcombine.high %v62_v46, %v62_v46  ;;  %v2868_v52 = vld [vmem:[#allocation2 + $0x164] ss:$16 sps:$4 sm:$0xff]   ;;  %v2872_v54 = vld [vmem:[#allocation2 + $0x160] ss:$16 sps:$4 sm:$0xff]   ;;  %v3365_v6 = vcombine.low %v62_v46, %v62_v46  ;;  %v2948_v46 = vld [vmem:[#allocation2 + $0x8] ss:$16 sps:$4 sm:$0xff]  }
  0x37   :  { %1305 = vmatpush1.bf16.msra.mxu0 %v2836_v26  ;;  %v2870_v53 = vld [vmem:[#allocation2 + $0x364] ss:$16 sps:$4 sm:$0xff]   ;;  %v2873_v55 = vld [vmem:[#allocation2 + $0x360] ss:$16 sps:$4 sm:$0xff]   ;;  %v2926_v26 = vld [vmem:[#allocation2 + $0x8c] ss:$16 sps:$4 sm:$0xff]  }
  0x38   :  { %1346 = vmatpush1.bf16.msra.mxu1 %v2837_v27  ;;  %1306 = vmatprep.subr.bf16.mxu0 %v2838_v28  ;;  %v2874_v56 = vld [vmem:[#allocation2 + $0x144] ss:$16 sps:$4 sm:$0xff]   ;;  %v2878_v58 = vld [vmem:[#allocation2 + $0x140] ss:$16 sps:$4 sm:$0xff]   ;;  %v2924_v28 = vld [vmem:[#allocation2 + $0x88] ss:$16 sps:$4 sm:$0xff]  }
  0x39   :  { %1347 = vmatprep.subr.bf16.mxu1 %v2840_v29  ;;  %1324 = vmatprep.mubr.bf16.mxu0 %v3356_v47  ;;  %v2876_v57 = vld [vmem:[#allocation2 + $0x344] ss:$16 sps:$4 sm:$0xff]   ;;  %v2879_v59 = vld [vmem:[#allocation2 + $0x340] ss:$16 sps:$4 sm:$0xff]  }
  0x3a   :  { %v2880_v60 = vld [vmem:[#allocation2 + $0x124] ss:$16 sps:$4 sm:$0xff]   ;;  %v2884_v62 = vld [vmem:[#allocation2 + $0x120] ss:$16 sps:$4 sm:$0xff]  }
  0x3b   :  { %1307 = vmatpush1.bf16.msra.mxu0 %v2842_v30  ;;  %v2882_v61 = vld [vmem:[#allocation2 + $0x324] ss:$16 sps:$4 sm:$0xff]   ;;  %v2885_v63 = vld [vmem:[#allocation2 + $0x320] ss:$16 sps:$4 sm:$0xff]   ;;  %v2932_v30 = vld [vmem:[#allocation2 + $0x6c] ss:$16 sps:$4 sm:$0xff]  }
  0x3c   :  { %1348 = vmatpush1.bf16.msra.mxu1 %v2843_v31  ;;  %1308 = vmatprep.subr.bf16.mxu0 %v2844_v32  ;;  %v2886_v0 = vld [vmem:[#allocation2 + $0x104] ss:$16 sps:$4 sm:$0xff]   ;;  %v2890_v2 = vld [vmem:[#allocation2 + $0x100] ss:$16 sps:$4 sm:$0xff]  }
  0x3d   :  { %1349 = vmatprep.subr.bf16.mxu1 %v2846_v33  ;;  %v2888_v1 = vld [vmem:[#allocation2 + $0x304] ss:$16 sps:$4 sm:$0xff]   ;;  %v2891_v3 = vld [vmem:[#allocation2 + $0x300] ss:$16 sps:$4 sm:$0xff]  }
  0x3e   :  { %v2898_v4 = vld [vmem:[#allocation2 + $0x4e4] ss:$16 sps:$4 sm:$0xff]   ;;  %v2896_v8 = vld [vmem:[#allocation2 + $0x4e0] ss:$16 sps:$4 sm:$0xff]  }
  0x3f   :  { %1309 = vmatpush2.bf16.msra.mxu0 %v2848_v34  ;;  %v2901_v5 = vld [vmem:[#allocation2 + $0x604] ss:$16 sps:$4 sm:$0xff]   ;;  %v2899_v9 = vld [vmem:[#allocation2 + $0x600] ss:$16 sps:$4 sm:$0xff]   ;;  %v2930_v34 = vld [vmem:[#allocation2 + $0x68] ss:$16 sps:$4 sm:$0xff]  }
  0x40   :  { %1350 = vmatpush2.bf16.msra.mxu1 %v2849_v35  ;;  %1310 = vmatprep.subr.bf16.mxu0 %v2850_v36  ;;  %v2904_v10 = vld [vmem:[#allocation2 + $0x4c4] ss:$16 sps:$4 sm:$0xff]   ;;  %v2902_v12 = vld [vmem:[#allocation2 + $0x4c0] ss:$16 sps:$4 sm:$0xff]   ;;  %v2938_v36 = vld [vmem:[#allocation2 + $0x4c] ss:$16 sps:$4 sm:$0xff]  }
  0x41   :  { %1351 = vmatprep.subr.bf16.mxu1 %v2852_v37  ;;  %v2910_v14 = vld [vmem:[#allocation2 + $0x4a4] ss:$16 sps:$4 sm:$0xff]   ;;  %v2908_v16 = vld [vmem:[#allocation2 + $0x4a0] ss:$16 sps:$4 sm:$0xff]  }
  0x42   :  { %v2917_v19 = vld [vmem:[#allocation2 + $0x484] ss:$16 sps:$4 sm:$0xff]   ;;  %v2915_v21 = vld [vmem:[#allocation2 + $0x480] ss:$16 sps:$4 sm:$0xff]  }
  0x43   :  { %1311 = vmatpush2.bf16.msra.mxu0 %v2854_v38  ;;  %v2923_v23 = vld [vmem:[#allocation2 + $0x464] ss:$16 sps:$4 sm:$0xff]   ;;  %v2921_v25 = vld [vmem:[#allocation2 + $0x460] ss:$16 sps:$4 sm:$0xff]   ;;  %v2936_v38 = vld [vmem:[#allocation2 + $0x48] ss:$16 sps:$4 sm:$0xff]  }
  0x44   :  { %1352 = vmatpush2.bf16.msra.mxu1 %v2855_v39  ;;  %1312 = vmatprep.subr.bf16.mxu0 %v2856_v40  ;;  %v2929_v27 = vld [vmem:[#allocation2 + $0x444] ss:$16 sps:$4 sm:$0xff]   ;;  %v2927_v29 = vld [vmem:[#allocation2 + $0x440] ss:$16 sps:$4 sm:$0xff]   ;;  %v2944_v40 = vld [vmem:[#allocation2 + $0x2c] ss:$16 sps:$4 sm:$0xff]  }
  0x45   :  { %1353 = vmatprep.subr.bf16.mxu1 %v2858_v41  ;;  %v2935_v31 = vld [vmem:[#allocation2 + $0x424] ss:$16 sps:$4 sm:$0xff]   ;;  %v2933_v35 = vld [vmem:[#allocation2 + $0x420] ss:$16 sps:$4 sm:$0xff]  }
  0x46   :  { %v3383_v32 = vld [vmem:[%s3504_s0 + $0x10] sm:$0xff] }
  0x47   :  { %1313 = vmatpush2.bf16.msra.mxu0 %v2860_v42  ;;  %v3387_v33 = vcombine.high %v3383_v32, %v3383_v32  ;;  %v2941_v37 = vld [vmem:[#allocation2 + $0x404] ss:$16 sps:$4 sm:$0xff]   ;;  %v2939_v39 = vld [vmem:[#allocation2 + $0x400] ss:$16 sps:$4 sm:$0xff]   ;;  %v2942_v42 = vld [vmem:[#allocation2 + $0x28] ss:$16 sps:$4 sm:$0xff]  }
  0x48   :  { %1354 = vmatpush2.bf16.msra.mxu1 %v2861_v43  ;;  %1314 = vmatprep.subr.bf16.mxu0 %v2862_v44  ;;  %v2947_v41 = vld [vmem:[#allocation2 + $0x5e4] ss:$16 sps:$4 sm:$0xff]   ;;  %v2945_v43 = vld [vmem:[#allocation2 + $0x5e0] ss:$16 sps:$4 sm:$0xff]   ;;  %v2950_v44 = vld [vmem:[#allocation2 + $0xc] ss:$16 sps:$4 sm:$0xff]  }
  0x49   :  { %1355 = vmatprep.subr.bf16.mxu1 %v2864_v45  ;;  %v2953_v45 = vld [vmem:[#allocation2 + $0x5c4] ss:$16 sps:$4 sm:$0xff]  }
  0x4b   :  { %1315 = vmatpush2.bf16.msra.mxu0 %v2866_v49  ;;  %v2959_v49 = vld [vmem:[#allocation2 + $0x5a4] ss:$16 sps:$4 sm:$0xff]  }
  0x4c   :  { %1356 = vmatpush2.bf16.msra.mxu1 %v2867_v50  ;;  %1316 = vmatprep.subr.bf16.mxu0 %v2868_v52  ;;  %v2954_v50 = vld [vmem:[#allocation2 + $0x1e8] ss:$16 sps:$4 sm:$0xff]   ;;  %v2957_v52 = vld [vmem:[#allocation2 + $0x5a0] ss:$16 sps:$4 sm:$0xff]  }
  0x4d   :  { %1357 = vmatprep.subr.bf16.mxu1 %v2870_v53  ;;  %v2962_v53 = vld [vmem:[#allocation2 + $0x1cc] ss:$16 sps:$4 sm:$0xff]  }
  0x4f   :  { %1317 = vmatpush2.bf16.msra.mxu0 %v2872_v54  ;;  %v2965_v54 = vld [vmem:[#allocation2 + $0x584] ss:$16 sps:$4 sm:$0xff]  }
  0x50   :  { %1358 = vmatpush2.bf16.msra.mxu1 %v2873_v55  ;;  %1318 = vmatprep.subr.bf16.mxu0 %v2874_v56  ;;  %v2960_v55 = vld [vmem:[#allocation2 + $0x1c8] ss:$16 sps:$4 sm:$0xff]   ;;  %v2963_v56 = vld [vmem:[#allocation2 + $0x580] ss:$16 sps:$4 sm:$0xff]  }
  0x51   :  { %1359 = vmatprep.subr.bf16.mxu1 %v2876_v57  ;;  %v2968_v57 = vld [vmem:[#allocation2 + $0x1ac] ss:$16 sps:$4 sm:$0xff]  }
  0x53   :  { %1319 = vmatpush2.bf16.msra.mxu0 %v2878_v58  ;;  %v2971_v58 = vld [vmem:[#allocation2 + $0x564] ss:$16 sps:$4 sm:$0xff]  }
  0x54   :  { %1360 = vmatpush2.bf16.msra.mxu1 %v2879_v59  ;;  %1320 = vmatprep.subr.bf16.mxu0 %v2880_v60  ;;  %v2966_v59 = vld [vmem:[#allocation2 + $0x1a8] ss:$16 sps:$4 sm:$0xff]   ;;  %v2969_v60 = vld [vmem:[#allocation2 + $0x560] ss:$16 sps:$4 sm:$0xff]  }
  0x55   :  { %1361 = vmatprep.subr.bf16.mxu1 %v2882_v61  ;;  %v2974_v61 = vld [vmem:[#allocation2 + $0x18c] ss:$16 sps:$4 sm:$0xff]  }
  0x57   :  { %1321 = vmatpush2.bf16.msra.mxu0 %v2884_v62  ;;  %v2977_v62 = vld [vmem:[#allocation2 + $0x544] ss:$16 sps:$4 sm:$0xff]  }
  0x58   :  { %1362 = vmatpush2.bf16.msra.mxu1 %v2885_v63  ;;  %1322 = vmatprep.subr.bf16.mxu0 %v2886_v0  ;;  %v2972_v63 = vld [vmem:[#allocation2 + $0x188] ss:$16 sps:$4 sm:$0xff]   ;;  %v2975_v0 = vld [vmem:[#allocation2 + $0x540] ss:$16 sps:$4 sm:$0xff]  }
  0x59   :  { %1363 = vmatprep.subr.bf16.mxu1 %v2888_v1  ;;  %v2980_v1 = vld [vmem:[#allocation2 + $0x16c] ss:$16 sps:$4 sm:$0xff]  }
  0x5b   :  { %1323 = vmatpush2.bf16.msra.mxu0 %v2890_v2  ;;  %v2983_v2 = vld [vmem:[#allocation2 + $0x524] ss:$16 sps:$4 sm:$0xff]  }
  0x5c   :  { %1364 = vmatpush2.bf16.msra.mxu1 %v2891_v3  ;;  %1374 = vmatprep.subr.bf16.mxu0 %v2898_v4  ;;  %v2978_v3 = vld [vmem:[#allocation2 + $0x168] ss:$16 sps:$4 sm:$0xff]   ;;  %v2981_v4 = vld [vmem:[#allocation2 + $0x520] ss:$16 sps:$4 sm:$0xff]  }
  0x5d   :  { %1429 = vmatprep.subr.bf16.mxu1 %v2901_v5  ;;  %v2986_v5 = vld [vmem:[#allocation2 + $0x14c] ss:$16 sps:$4 sm:$0xff]  }
  0x5e   :  { %1325 = vmatmul.mubr.bf16.vlgmr.msra.gmra.mxu0 %v3365_v6 }
  0x5f   :  { %1366 = vmatmul.mubr.bf16.vlgmr.msra.gmra.mxu1 %v3367_v7  ;;  %1375 = vmatpush1.bf16.msra.mxu0 %v2896_v8  ;;  %v2989_v8 = vld [vmem:[#allocation2 + $0x504] ss:$16 sps:$4 sm:$0xff]  }
  0x60   :  { %1430 = vmatpush1.bf16.msra.mxu1 %v2899_v9  ;;  %1376 = vmatprep.subr.bf16.mxu0 %v2904_v10  ;;  %v2984_v9 = vld [vmem:[#allocation2 + $0x148] ss:$16 sps:$4 sm:$0xff]   ;;  %v2987_v10 = vld [vmem:[#allocation2 + $0x500] ss:$16 sps:$4 sm:$0xff]  }
  0x61   :  { %1447 = vmatprep.mubr.bf16.mxu1 %v3293_v13  ;;  %1456 = vmatprep.subr.bf16.mxu1 %v2907_v11  ;;  %v2994_v11 = vld [vmem:[#allocation2 + $0x12c] ss:$16 sps:$4 sm:$0xff]  }
  0x62   :  { %1406 = vmatprep.mubr.bf16.mxu0 %v3387_v33 }
  0x63   :  { %1377 = vmatpush1.bf16.msra.mxu0 %v2902_v12  ;;  %v2997_v12 = vld [vmem:[#allocation2 + $0x2ec] ss:$16 sps:$4 sm:$0xff]  }
  0x64   :  { %1378 = vmatprep.subr.bf16.mxu0 %v2910_v14  ;;  %v3392_v14 = vcombine.low %v3383_v32, %v3383_v32  ;;  %v3016_v32 = vld [vmem:[#allocation2 + $0x4a8] ss:$16 sps:$4 sm:$0xff]  }
  0x67   :  { %2643 = vmatmul.mubr.msk.bf16.vlgmr.msra.gmra.mxu1 %vm1288_vm0, %v3375_v17  ;;  %1379 = vmatpush1.bf16.msra.mxu0 %v2908_v16  ;;  %v2995_v16 = vld [vmem:[#allocation2 + $0x2e8] ss:$16 sps:$4 sm:$0xff]  }
  0x68   :  { %1457 = vmatpush1.bf16.msra.mxu1 %v2905_v15  ;;  %1380 = vmatprep.subr.bf16.mxu0 %v2917_v19  ;;  %v2992_v15 = vld [vmem:[#allocation2 + $0x128] ss:$16 sps:$4 sm:$0xff]   ;;  %v3003_v19 = vld [vmem:[#allocation2 + $0x2cc] ss:$16 sps:$4 sm:$0xff]  }
  0x69   :  { %1458 = vmatprep.subr.bf16.mxu1 %v2914_v18  ;;  %1488 = vmatprep.mubr.bf16.mxu1 %v3356_v47  ;;  %v2951_v47 = vld [vmem:[#allocation2 + $0x5c0] ss:$16 sps:$4 sm:$0xff]   ;;  %v3000_v18 = vld [vmem:[#allocation2 + $0x10c] ss:$16 sps:$4 sm:$0xff]  }
  0x6b   :  { %1381 = vmatpush1.bf16.msra.mxu0 %v2915_v21  ;;  %v3001_v21 = vld [vmem:[#allocation2 + $0x2c8] ss:$16 sps:$4 sm:$0xff]  }
  0x6c   :  { %1459 = vmatpush1.bf16.msra.mxu1 %v2912_v20  ;;  %1382 = vmatprep.subr.bf16.mxu0 %v2923_v23  ;;  %v2998_v20 = vld [vmem:[#allocation2 + $0x108] ss:$16 sps:$4 sm:$0xff]   ;;  %v3009_v23 = vld [vmem:[#allocation2 + $0x2ac] ss:$16 sps:$4 sm:$0xff]  }
  0x6d   :  { %1460 = vmatprep.subr.bf16.mxu1 %v2920_v22  ;;  %v3006_v22 = vld [vmem:[#allocation2 + $0x4ec] ss:$16 sps:$4 sm:$0xff]  }
  0x6f   :  { %1383 = vmatpush1.bf16.msra.mxu0 %v2921_v25  ;;  %v3007_v25 = vld [vmem:[#allocation2 + $0x2a8] ss:$16 sps:$4 sm:$0xff]  }
  0x70   :  { %1461 = vmatpush1.bf16.msra.mxu1 %v2918_v24  ;;  %1384 = vmatprep.subr.bf16.mxu0 %v2929_v27  ;;  %v3004_v24 = vld [vmem:[#allocation2 + $0x4e8] ss:$16 sps:$4 sm:$0xff]   ;;  %v3015_v27 = vld [vmem:[#allocation2 + $0x28c] ss:$16 sps:$4 sm:$0xff]  }
  0x71   :  { %1462 = vmatprep.subr.bf16.mxu1 %v2926_v26  ;;  %v3012_v26 = vld [vmem:[#allocation2 + $0x4cc] ss:$16 sps:$4 sm:$0xff]  }
  0x73   :  { %1385 = vmatpush1.bf16.msra.mxu0 %v2927_v29  ;;  %v3013_v29 = vld [vmem:[#allocation2 + $0x288] ss:$16 sps:$4 sm:$0xff]  }
  0x74   :  { %1463 = vmatpush1.bf16.msra.mxu1 %v2924_v28  ;;  %1386 = vmatprep.subr.bf16.mxu0 %v2935_v31  ;;  %v3010_v28 = vld [vmem:[#allocation2 + $0x4c8] ss:$16 sps:$4 sm:$0xff]   ;;  %v3021_v31 = vld [vmem:[#allocation2 + $0x26c] ss:$16 sps:$4 sm:$0xff]  }
  0x75   :  { %1464 = vmatprep.subr.bf16.mxu1 %v2932_v30  ;;  %v3018_v30 = vld [vmem:[#allocation2 + $0x4ac] ss:$16 sps:$4 sm:$0xff]  }
  0x77   :  { %1387 = vmatpush1.bf16.msra.mxu0 %v2933_v35  ;;  %v3027_v35 = vld [vmem:[#allocation2 + $0x24c] ss:$16 sps:$4 sm:$0xff]  }
  0x78   :  { %1465 = vmatpush1.bf16.msra.mxu1 %v2930_v34  ;;  %1388 = vmatprep.subr.bf16.mxu0 %v2941_v37  ;;  %v3024_v34 = vld [vmem:[#allocation2 + $0x48c] ss:$16 sps:$4 sm:$0xff]  }
  0x79   :  { %1466 = vmatprep.subr.bf16.mxu1 %v2938_v36  ;;  %v3022_v36 = vld [vmem:[#allocation2 + $0x488] ss:$16 sps:$4 sm:$0xff]   ;;  %v3030_v37 = vld [vmem:[#allocation2 + $0x46c] ss:$16 sps:$4 sm:$0xff]  }
  0x7b   :  { %1389 = vmatpush1.bf16.msra.mxu0 %v2939_v39  ;;  %v3028_v39 = vld [vmem:[#allocation2 + $0x468] ss:$16 sps:$4 sm:$0xff]  }
  0x7c   :  { %1467 = vmatpush1.bf16.msra.mxu1 %v2936_v38  ;;  %1390 = vmatprep.subr.bf16.mxu0 %v2947_v41  ;;  %v3033_v38 = vld [vmem:[#allocation2 + $0x22c] ss:$16 sps:$4 sm:$0xff]  }
  0x7d   :  { %1468 = vmatprep.subr.bf16.mxu1 %v2944_v40  ;;  %v3036_v40 = vld [vmem:[#allocation2 + $0x44c] ss:$16 sps:$4 sm:$0xff]  }
  0x7e   :  { %v3039_v41 = vld [vmem:[#allocation2 + $0x20c] ss:$16 sps:$4 sm:$0xff]  }
  0x7f   :  { %1391 = vmatpush2.bf16.msra.mxu0 %v2945_v43  ;;  %v3037_v43 = vld [vmem:[#allocation2 + $0x208] ss:$16 sps:$4 sm:$0xff]  }
  0x80   :  { %1469 = vmatpush1.bf16.msra.mxu1 %v2942_v42  ;;  %1392 = vmatprep.subr.bf16.mxu0 %v2953_v45  ;;  %v3034_v42 = vld [vmem:[#allocation2 + $0x448] ss:$16 sps:$4 sm:$0xff]   ;;  %v3045_v45 = vld [vmem:[#allocation2 + $0x3ec] ss:$16 sps:$4 sm:$0xff]  }
  0x81   :  { %1470 = vmatprep.subr.bf16.mxu1 %v2950_v44  ;;  %v3042_v44 = vld [vmem:[#allocation2 + $0x42c] ss:$16 sps:$4 sm:$0xff]  }
  0x83   :  { %1393 = vmatpush2.bf16.msra.mxu0 %v2951_v47  ;;  %v3043_v47 = vld [vmem:[#allocation2 + $0x3e8] ss:$16 sps:$4 sm:$0xff]  }
  0x84   :  { %1471 = vmatpush1.bf16.msra.mxu1 %v2948_v46  ;;  %1394 = vmatprep.subr.bf16.mxu0 %v2959_v49  ;;  %v3040_v46 = vld [vmem:[#allocation2 + $0x428] ss:$16 sps:$4 sm:$0xff]   ;;  %v3051_v49 = vld [vmem:[#allocation2 + $0x3cc] ss:$16 sps:$4 sm:$0xff]  }
  0x85   :  { %1472 = vmatprep.subr.bf16.mxu1 %v2956_v48  ;;  %v3048_v48 = vld [vmem:[#allocation2 + $0x40c] ss:$16 sps:$4 sm:$0xff]  }
  0x87   :  { %1395 = vmatpush2.bf16.msra.mxu0 %v2957_v52  ;;  %v3049_v52 = vld [vmem:[#allocation2 + $0x3c8] ss:$16 sps:$4 sm:$0xff]  }
  0x88   :  { %1473 = vmatpush2.bf16.msra.mxu1 %v2954_v50  ;;  %1396 = vmatprep.subr.bf16.mxu0 %v2965_v54  ;;  %v3046_v50 = vld [vmem:[#allocation2 + $0x408] ss:$16 sps:$4 sm:$0xff]   ;;  %v3057_v54 = vld [vmem:[#allocation2 + $0x3ac] ss:$16 sps:$4 sm:$0xff]  }
  0x89   :  { %1474 = vmatprep.subr.bf16.mxu1 %v2962_v53  ;;  %v3054_v53 = vld [vmem:[#allocation2 + $0x5ec] ss:$16 sps:$4 sm:$0xff]  }
  0x8b   :  { %1397 = vmatpush2.bf16.msra.mxu0 %v2963_v56  ;;  %v3055_v56 = vld [vmem:[#allocation2 + $0x3a8] ss:$16 sps:$4 sm:$0xff]  }
  0x8c   :  { %1475 = vmatpush2.bf16.msra.mxu1 %v2960_v55  ;;  %1398 = vmatprep.subr.bf16.mxu0 %v2971_v58  ;;  %v3052_v55 = vld [vmem:[#allocation2 + $0x5e8] ss:$16 sps:$4 sm:$0xff]   ;;  %v3063_v58 = vld [vmem:[#allocation2 + $0x38c] ss:$16 sps:$4 sm:$0xff]  }
  0x8d   :  { %1476 = vmatprep.subr.bf16.mxu1 %v2968_v57  ;;  %v3060_v57 = vld [vmem:[#allocation2 + $0x5cc] ss:$16 sps:$4 sm:$0xff]  }
  0x8f   :  { %1399 = vmatpush2.bf16.msra.mxu0 %v2969_v60  ;;  %v3061_v60 = vld [vmem:[#allocation2 + $0x388] ss:$16 sps:$4 sm:$0xff]  }
  0x90   :  { %1477 = vmatpush2.bf16.msra.mxu1 %v2966_v59  ;;  %1400 = vmatprep.subr.bf16.mxu0 %v2977_v62  ;;  %v3058_v59 = vld [vmem:[#allocation2 + $0x5c8] ss:$16 sps:$4 sm:$0xff]   ;;  %v3069_v62 = vld [vmem:[#allocation2 + $0x36c] ss:$16 sps:$4 sm:$0xff]  }
  0x91   :  { %1478 = vmatprep.subr.bf16.mxu1 %v2974_v61  ;;  %v3066_v61 = vld [vmem:[#allocation2 + $0x5ac] ss:$16 sps:$4 sm:$0xff]  }
  0x93   :  { %1401 = vmatpush2.bf16.msra.mxu0 %v2975_v0  ;;  %v3067_v0 = vld [vmem:[#allocation2 + $0x368] ss:$16 sps:$4 sm:$0xff]  }
  0x94   :  { %1479 = vmatpush2.bf16.msra.mxu1 %v2972_v63  ;;  %1402 = vmatprep.subr.bf16.mxu0 %v2983_v2  ;;  %v3064_v63 = vld [vmem:[#allocation2 + $0x5a8] ss:$16 sps:$4 sm:$0xff]   ;;  %v3075_v2 = vld [vmem:[#allocation2 + $0x34c] ss:$16 sps:$4 sm:$0xff]  }
  0x95   :  { %1480 = vmatprep.subr.bf16.mxu1 %v2980_v1  ;;  %v3072_v1 = vld [vmem:[#allocation2 + $0x58c] ss:$16 sps:$4 sm:$0xff]  }
  0x97   :  { %1403 = vmatpush2.bf16.msra.mxu0 %v2981_v4  ;;  %v3073_v4 = vld [vmem:[#allocation2 + $0x348] ss:$16 sps:$4 sm:$0xff]  }
  0x98   :  { %1481 = vmatpush2.bf16.msra.mxu1 %v2978_v3  ;;  %1404 = vmatprep.subr.bf16.mxu0 %v2989_v8  ;;  %v3070_v3 = vld [vmem:[#allocation2 + $0x588] ss:$16 sps:$4 sm:$0xff]   ;;  %v3081_v8 = vld [vmem:[#allocation2 + $0x32c] ss:$16 sps:$4 sm:$0xff]  }
  0x99   :  { %1482 = vmatprep.subr.bf16.mxu1 %v2986_v5  ;;  %v3078_v5 = vld [vmem:[#allocation2 + $0x56c] ss:$16 sps:$4 sm:$0xff]  }
  0x9b   :  { %1405 = vmatpush2.bf16.msra.mxu0 %v2987_v10  ;;  %v3079_v10 = vld [vmem:[#allocation2 + $0x328] ss:$16 sps:$4 sm:$0xff]  }
  0x9c   :  { %1483 = vmatpush2.bf16.msra.mxu1 %v2984_v9  ;;  %1497 = vmatprep.subr.bf16.mxu0 %v2997_v12  ;;  %v3076_v9 = vld [vmem:[#allocation2 + $0x568] ss:$16 sps:$4 sm:$0xff]   ;;  %v3087_v12 = vld [vmem:[#allocation2 + $0x30c] ss:$16 sps:$4 sm:$0xff]  }
  0x9d   :  { %1484 = vmatprep.subr.bf16.mxu1 %v2994_v11  ;;  %v3084_v11 = vld [vmem:[#allocation2 + $0x54c] ss:$16 sps:$4 sm:$0xff]  }
  0x9e   :  { %1407 = vmatmul.mubr.bf16.vlgmr.msra.gmra.mxu0 %v3392_v14 }
  0x9f   :  { %1498 = vmatpush1.bf16.msra.mxu0 %v2995_v16  ;;  %1529 = vmatprep.mubr.bf16.mxu0 %v3361_v51  ;;  %v3019_v51 = vld [vmem:[#allocation2 + $0x268] ss:$16 sps:$4 sm:$0xff]  }
  0xa0   :  { %1485 = vmatpush2.bf16.msra.mxu1 %v2992_v15  ;;  %1499 = vmatprep.subr.bf16.mxu0 %v3003_v19  ;;  %v3082_v15 = vld [vmem:[#allocation2 + $0x548] ss:$16 sps:$4 sm:$0xff]   ;;  %v3093_v19 = vld [vmem:[#allocation2 + $0x60c] ss:$16 sps:$4 sm:$0xff]  }
  0xa1   :  { %1486 = vmatprep.subr.bf16.mxu1 %v3000_v18  ;;  %v3085_v16 = vld [vmem:[#allocation2 + $0x308] ss:$16 sps:$4 sm:$0xff]   ;;  %v3090_v18 = vld [vmem:[#allocation2 + $0x52c] ss:$16 sps:$4 sm:$0xff]  }
  0xa3   :  { %1500 = vmatpush1.bf16.msra.mxu0 %v3001_v21  ;;  %v3091_v21 = vld [vmem:[#allocation2 + $0x608] ss:$16 sps:$4 sm:$0xff]  }
  0xa4   :  { %1487 = vmatpush2.bf16.msra.mxu1 %v2998_v20  ;;  %1501 = vmatprep.subr.bf16.mxu0 %v3009_v23  ;;  %v3088_v20 = vld [vmem:[#allocation2 + $0x528] ss:$16 sps:$4 sm:$0xff]   ;;  %v3099_v23 = vld [vmem:[#allocation5 + $0x74] ss:$8 sps:$4 sm:$0xff]  }
  0xa5   :  { %1538 = vmatprep.subr.bf16.mxu1 %v3006_v22  ;;  %v3096_v22 = vld [vmem:[#allocation2 + $0x50c] ss:$16 sps:$4 sm:$0xff]  }
  0xa7   :  { %1489 = vmatmul.mubr.bf16.vlgmr.msra.gmra.mxu1 %v3365_v6  ;;  %1502 = vmatpush1.bf16.msra.mxu0 %v3007_v25  ;;  %v3025_v6 = vld [vmem:[#allocation2 + $0x248] ss:$16 sps:$4 sm:$0xff]  }
  0xa8   :  { %1539 = vmatpush1.bf16.msra.mxu1 %v3004_v24  ;;  %1503 = vmatprep.subr.bf16.mxu0 %v3015_v27  ;;  %v3094_v24 = vld [vmem:[#allocation2 + $0x508] ss:$16 sps:$4 sm:$0xff]  }
  0xa9   :  { %1540 = vmatprep.subr.bf16.mxu1 %v3012_v26  ;;  %1570 = vmatprep.mubr.bf16.mxu1 %v3387_v33  ;;  %v3031_v33 = vld [vmem:[#allocation2 + $0x228] ss:$16 sps:$4 sm:$0xff]   ;;  %v3102_v26 = vld [vmem:[#allocation5 + $0x64] ss:$8 sps:$4 sm:$0xff]  }
  0xaa   :  { %v3097_v25 = vld [vmem:[#allocation5 + $0x70] ss:$8 sps:$4 sm:$0xff]   ;;  %v3100_v27 = vld [vmem:[#allocation5 + $0x60] ss:$8 sps:$4 sm:$0xff]  }
  0xab   :  { %1504 = vmatpush1.bf16.msra.mxu0 %v3013_v29  ;;  %v3108_v29 = vld [vmem:[#allocation5 + $0x44] ss:$8 sps:$4 sm:$0xff]  }
  0xac   :  { %1541 = vmatpush1.bf16.msra.mxu1 %v3010_v28  ;;  %1505 = vmatprep.subr.bf16.mxu0 %v3021_v31  ;;  %v3105_v28 = vld [vmem:[#allocation5 + $0x54] ss:$8 sps:$4 sm:$0xff]  }
  0xad   :  { %1542 = vmatprep.subr.bf16.mxu1 %v3018_v30  ;;  %v3145_v30 = vld [vmem:[#allocation5 + $0x170] ss:$8 sps:$4 sm:$0xff]   ;;  %v3147_v31 = vld [vmem:[#allocation5 + $0x174] ss:$8 sps:$4 sm:$0xff]  }
  0xaf   :  { %1506 = vmatpush1.bf16.msra.mxu0 %v3019_v51  ;;  %v3148_v51 = vld [vmem:[#allocation5 + $0x160] ss:$8 sps:$4 sm:$0xff]  }
  0xb0   :  { %1543 = vmatpush1.bf16.msra.mxu1 %v3016_v32  ;;  %1507 = vmatprep.subr.bf16.mxu0 %v3027_v35  ;;  %v3106_v32 = vld [vmem:[#allocation5 + $0x40] ss:$8 sps:$4 sm:$0xff]   ;;  %v3151_v35 = vld [vmem:[#allocation5 + $0x150] ss:$8 sps:$4 sm:$0xff]  }
  0xb1   :  { %1544 = vmatprep.subr.bf16.mxu1 %v3024_v34  ;;  %v3109_v34 = vld [vmem:[#allocation5 + $0x30] ss:$8 sps:$4 sm:$0xff]  }
  0xb3   :  { %1508 = vmatpush1.bf16.msra.mxu0 %v3025_v6  ;;  %v3156_v6 = vld [vmem:[#allocation5 + $0x144] ss:$8 sps:$4 sm:$0xff]  }
  0xb4   :  { %1545 = vmatpush1.bf16.msra.mxu1 %v3022_v36  ;;  %1509 = vmatprep.subr.bf16.mxu0 %v3033_v38  ;;  %v3114_v36 = vld [vmem:[#allocation5 + $0x24] ss:$8 sps:$4 sm:$0xff]   ;;  %v3154_v38 = vld [vmem:[#allocation5 + $0x140] ss:$8 sps:$4 sm:$0xff]  }
  0xb5   :  { %1546 = vmatprep.subr.bf16.mxu1 %v3030_v37  ;;  %v3112_v37 = vld [vmem:[#allocation5 + $0x20] ss:$8 sps:$4 sm:$0xff]  }
  0xb7   :  { %1510 = vmatpush1.bf16.msra.mxu0 %v3031_v33  ;;  %v3159_v33 = vld [vmem:[#allocation5 + $0x134] ss:$8 sps:$4 sm:$0xff]  }
  0xb8   :  { %1547 = vmatpush1.bf16.msra.mxu1 %v3028_v39  ;;  %1511 = vmatprep.subr.bf16.mxu0 %v3039_v41  ;;  %v3117_v39 = vld [vmem:[#allocation5 + $0x14] ss:$8 sps:$4 sm:$0xff]   ;;  %v3157_v41 = vld [vmem:[#allocation5 + $0x130] ss:$8 sps:$4 sm:$0xff]  }
  0xb9   :  { %1548 = vmatprep.subr.bf16.mxu1 %v3036_v40  ;;  %v3115_v40 = vld [vmem:[#allocation5 + $0x10] ss:$8 sps:$4 sm:$0xff]  }
  0xbb   :  { %1512 = vmatpush1.bf16.msra.mxu0 %v3037_v43  ;;  %v3162_v43 = vld [vmem:[#allocation5 + $0x124] ss:$8 sps:$4 sm:$0xff]  }
  0xbc   :  { %1549 = vmatpush1.bf16.msra.mxu1 %v3034_v42  ;;  %1513 = vmatprep.subr.bf16.mxu0 %v3045_v45  ;;  %v3120_v42 = vld [vmem:[#allocation5 + $0x4] ss:$8 sps:$4 sm:$0xff]   ;;  %v3160_v45 = vld [vmem:[#allocation5 + $0x120] ss:$8 sps:$4 sm:$0xff]  }
  0xbd   :  { %1550 = vmatprep.subr.bf16.mxu1 %v3042_v44  ;;  %v3118_v44 = vld [vmem:[#allocation5] ss:$8 sps:$4 sm:$0xff]  }
  0xbf   :  { %1514 = vmatpush2.bf16.msra.mxu0 %v3043_v47  ;;  %v3165_v47 = vld [vmem:[#allocation5 + $0x114] ss:$8 sps:$4 sm:$0xff]  }
  0xc0   :  { %1551 = vmatpush1.bf16.msra.mxu1 %v3040_v46  ;;  %1515 = vmatprep.subr.bf16.mxu0 %v3051_v49  ;;  %v3123_v46 = vld [vmem:[#allocation5 + $0xf4] ss:$8 sps:$4 sm:$0xff]   ;;  %v3163_v49 = vld [vmem:[#allocation5 + $0x110] ss:$8 sps:$4 sm:$0xff]  }
  0xc1   :  { %1552 = vmatprep.subr.bf16.mxu1 %v3048_v48  ;;  %v3121_v48 = vld [vmem:[#allocation5 + $0xf0] ss:$8 sps:$4 sm:$0xff]  }
  0xc3   :  { %1516 = vmatpush2.bf16.msra.mxu0 %v3049_v52  ;;  %v3168_v52 = vld [vmem:[#allocation5 + $0x104] ss:$8 sps:$4 sm:$0xff]  }
  0xc4   :  { %1553 = vmatpush1.bf16.msra.mxu1 %v3046_v50  ;;  %1517 = vmatprep.subr.bf16.mxu0 %v3057_v54  ;;  %v3126_v50 = vld [vmem:[#allocation5 + $0xe4] ss:$8 sps:$4 sm:$0xff]   ;;  %v3166_v54 = vld [vmem:[#allocation5 + $0x100] ss:$8 sps:$4 sm:$0xff]  }
  0xc5   :  { %1554 = vmatprep.subr.bf16.mxu1 %v3054_v53  ;;  %v3124_v53 = vld [vmem:[#allocation5 + $0xe0] ss:$8 sps:$4 sm:$0xff]  }
  0xc7   :  { %1518 = vmatpush2.bf16.msra.mxu0 %v3055_v56  ;;  %v3171_v56 = vld [vmem:[#allocation5 + $0x1f4] ss:$8 sps:$4 sm:$0xff]  }
  0xc8   :  { %1555 = vmatpush2.bf16.msra.mxu1 %v3052_v55  ;;  %1519 = vmatprep.subr.bf16.mxu0 %v3063_v58  ;;  %v3129_v55 = vld [vmem:[#allocation5 + $0xd4] ss:$8 sps:$4 sm:$0xff]   ;;  %v3169_v58 = vld [vmem:[#allocation5 + $0x1f0] ss:$8 sps:$4 sm:$0xff]  }
  0xc9   :  { %1556 = vmatprep.subr.bf16.mxu1 %v3060_v57  ;;  %v3127_v57 = vld [vmem:[#allocation5 + $0xd0] ss:$8 sps:$4 sm:$0xff]  }
  0xcb   :  { %1520 = vmatpush2.bf16.msra.mxu0 %v3061_v60  ;;  %v3174_v60 = vld [vmem:[#allocation5 + $0x1e4] ss:$8 sps:$4 sm:$0xff]  }
  0xcc   :  { %1557 = vmatpush2.bf16.msra.mxu1 %v3058_v59  ;;  %1521 = vmatprep.subr.bf16.mxu0 %v3069_v62  ;;  %v3132_v59 = vld [vmem:[#allocation5 + $0xc4] ss:$8 sps:$4 sm:$0xff]   ;;  %v3172_v62 = vld [vmem:[#allocation5 + $0x1e0] ss:$8 sps:$4 sm:$0xff]  }
  0xcd   :  { %1558 = vmatprep.subr.bf16.mxu1 %v3066_v61  ;;  %v3130_v61 = vld [vmem:[#allocation5 + $0xc0] ss:$8 sps:$4 sm:$0xff]  }
  0xcf   :  { %1522 = vmatpush2.bf16.msra.mxu0 %v3067_v0  ;;  %v3177_v0 = vld [vmem:[#allocation5 + $0x1d4] ss:$8 sps:$4 sm:$0xff]  }
  0xd0   :  { %1559 = vmatpush2.bf16.msra.mxu1 %v3064_v63  ;;  %1523 = vmatprep.subr.bf16.mxu0 %v3075_v2  ;;  %v3135_v63 = vld [vmem:[#allocation5 + $0xb4] ss:$8 sps:$4 sm:$0xff]   ;;  %v3175_v2 = vld [vmem:[#allocation5 + $0x1d0] ss:$8 sps:$4 sm:$0xff]  }
  0xd1   :  { %1560 = vmatprep.subr.bf16.mxu1 %v3072_v1  ;;  %v3133_v1 = vld [vmem:[#allocation5 + $0xb0] ss:$8 sps:$4 sm:$0xff]  }
  0xd3   :  { %1524 = vmatpush2.bf16.msra.mxu0 %v3073_v4  ;;  %v3136_v4 = vld [vmem:[#allocation5 + $0xa0] ss:$8 sps:$4 sm:$0xff]  }
  0xd4   :  { %1561 = vmatpush2.bf16.msra.mxu1 %v3070_v3  ;;  %1525 = vmatprep.subr.bf16.mxu0 %v3081_v8  ;;  %v3138_v3 = vld [vmem:[#allocation5 + $0xa4] ss:$8 sps:$4 sm:$0xff]   ;;  %v3139_v8 = vld [vmem:[#allocation5 + $0x90] ss:$8 sps:$4 sm:$0xff]  }
  0xd5   :  { %1562 = vmatprep.subr.bf16.mxu1 %v3078_v5  ;;  %v3141_v5 = vld [vmem:[#allocation5 + $0x94] ss:$8 sps:$4 sm:$0xff]  }
  0xd7   :  { %1526 = vmatpush2.bf16.msra.mxu0 %v3079_v10  ;;  %v3180_v10 = vld [vmem:[#allocation5 + $0x1c4] ss:$8 sps:$4 sm:$0xff]  }
  0xd8   :  { %1563 = vmatpush2.bf16.msra.mxu1 %v3076_v9  ;;  %1527 = vmatprep.subr.bf16.mxu0 %v3087_v12  ;;  %v3144_v9 = vld [vmem:[#allocation5 + $0x84] ss:$8 sps:$4 sm:$0xff]  }
  0xd9   :  { %1564 = vmatprep.subr.bf16.mxu1 %v3084_v11 }
  0xdb   :  { %1528 = vmatpush2.bf16.msra.mxu0 %v3085_v16  ;;  %v3142_v16 = vld [vmem:[#allocation5 + $0x80] ss:$8 sps:$4 sm:$0xff]  }
  0xdc   :  { %1565 = vmatpush2.bf16.msra.mxu1 %v3082_v15  ;;  %1593 = vmatprep.subr.bf16.mxu0 %v3093_v19  ;;  %v3178_v15 = vld [vmem:[#allocation5 + $0x1c0] ss:$8 sps:$4 sm:$0xff]  }
  0xdd   :  { %1566 = vmatprep.subr.bf16.mxu1 %v3090_v18 }
  0xde   :  { %1530 = vmatmul.mubr.bf16.vlgmr.msra.gmra.mxu0 %v3367_v7  ;;  %v3103_v7 = vld [vmem:[#allocation5 + $0x50] ss:$8 sps:$4 sm:$0xff]  }
  0xdf   :  { %1594 = vmatpush1.bf16.msra.mxu0 %v3091_v21  ;;  %1611 = vmatprep.mubr.bf16.mxu0 %v3293_v13  ;;  %v3150_v13 = vld [vmem:[#allocation5 + $0x164] ss:$8 sps:$4 sm:$0xff]  }
  0xe0   :  { %1567 = vmatpush2.bf16.msra.mxu1 %v3088_v20  ;;  %2032 = vmatprep.subr.bf16.mxu0 %v3099_v23  ;;  %v3183_v20 = vld [vmem:[#allocation5 + $0x1b4] ss:$8 sps:$4 sm:$0xff]   ;;  %v3181_v23 = vld [vmem:[#allocation5 + $0x1b0] ss:$8 sps:$4 sm:$0xff]  }
  0xe1   :  { %1568 = vmatprep.subr.bf16.mxu1 %v3096_v22 }
  0xe4   :  { %1569 = vmatpush2.bf16.msra.mxu1 %v3094_v24 }
  0xe5   :  { %2073 = vmatprep.subr.bf16.mxu1 %v3147_v31  ;;  %v3187_v31 = vld [vmem:[#allocation5 + $0x190] ss:$8 sps:$4 sm:$0xff]  }
  0xe6   :  { %2644 = vmatmul.mubr.msk.bf16.vlgmr.msra.gmra.mxu0 %vm1288_vm0, %v3375_v17  ;;  %v3153_v17 = vld [vmem:[#allocation5 + $0x154] ss:$8 sps:$4 sm:$0xff]  }
  0xe7   :  { %1571 = vmatmul.mubr.bf16.vlgmr.msra.gmra.mxu1 %v3392_v14  ;;  %2033 = vmatpush1.bf16.msra.mxu0 %v3097_v25  ;;  %v3111_v14 = vld [vmem:[#allocation5 + $0x34] ss:$8 sps:$4 sm:$0xff]  }
  0xe8   :  { %2034 = vmatprep.subr.bf16.mxu0 %v3102_v26  ;;  %2074 = vmatpush1.bf16.msra.mxu1 %v3145_v30  ;;  %v3186_v26 = vld [vmem:[#allocation5 + $0x1a4] ss:$8 sps:$4 sm:$0xff]  }
  0xe9   :  { %2075 = vmatprep.subr.bf16.mxu1 %v3150_v13 }
  0xeb   :  { %2035 = vmatpush1.bf16.msra.mxu0 %v3100_v27 }
  0xec   :  { %2036 = vmatprep.subr.bf16.mxu0 %v3105_v28  ;;  %2076 = vmatpush1.bf16.msra.mxu1 %v3148_v51  ;;  %v3184_v28 = vld [vmem:[#allocation5 + $0x1a0] ss:$8 sps:$4 sm:$0xff]  }
  0xed   :  { %2077 = vmatprep.subr.bf16.mxu1 %v3153_v17  ;;  %v3190_v51 = vld [vmem:[#allocation5 + $0x180] ss:$8 sps:$4 sm:$0xff]  }
  0xef   :  { %2037 = vmatpush1.bf16.msra.mxu0 %v3103_v7 }
  0xf0   :  { %2038 = vmatprep.subr.bf16.mxu0 %v3108_v29  ;;  %2078 = vmatpush1.bf16.msra.mxu1 %v3151_v35  ;;  %v3189_v29 = vld [vmem:[#allocation5 + $0x194] ss:$8 sps:$4 sm:$0xff]   ;;  %v262_v35 = vld [vmem:[%s3506_s2] sm:$0xf] }
  0xf1   :  { %2079 = vmatprep.subr.bf16.mxu1 %v3156_v6 }
  0xf3   :  { %2039 = vmatpush1.bf16.msra.mxu0 %v3106_v32  ;;  %v3192_v32 = vld [vmem:[#allocation5 + $0x184] ss:$8 sps:$4 sm:$0xff]  }
  0xf4   :  { %2040 = vmatprep.subr.bf16.mxu0 %v3111_v14  ;;  %2080 = vmatpush1.bf16.msra.mxu1 %v3154_v38  ;;  %v264_v14 = vlaneseq }
  0xf5   :  { %2081 = vmatprep.subr.bf16.mxu1 %v3159_v33 }
  0xf6   :  { %v3403_v17 = vshrl.u32 %v264_v14, 7  ;;  %v3198_v14 = vld [vmem:[%s3509_s5 + $0x28] sm:$0xff]  }
  0xf7   :  { %2041 = vmatpush1.bf16.msra.mxu0 %v3109_v34 }
  0xf8   :  { %2042 = vmatprep.subr.bf16.mxu0 %v3114_v36  ;;  %2082 = vmatpush1.bf16.msra.mxu1 %v3157_v41  ;;  %v266_v34 = vsub.s32 0, %v3403_v17  ;;  %v270_v36 = vsub.s32 1, %v3403_v17 }
  0xf9   :  { %2083 = vmatprep.subr.bf16.mxu1 %v3162_v43 }
  0xfa   :  { %v267_v6 = vrot.slane %v262_v35, %v266_v34 }
  0xfb   :  { %2043 = vmatpush1.bf16.msra.mxu0 %v3112_v37  ;;  %v271_v37 = vrot.slane %v262_v35, %v270_v36 }
  0xfc   :  { %2044 = vmatprep.subr.bf16.mxu0 %v3117_v39  ;;  %2084 = vmatpush1.bf16.msra.mxu1 %v3160_v45 }
  0xfd   :  { %2085 = vmatprep.subr.bf16.mxu1 %v3165_v47 }
  0xff   :  { %2045 = vmatpush1.bf16.msra.mxu0 %v3115_v40 }
 0x100   :  { %2046 = vmatprep.subr.bf16.mxu0 %v3120_v42  ;;  %2086 = vmatpush1.bf16.msra.mxu1 %v3163_v49 }
 0x101   :  { %2087 = vmatprep.subr.bf16.mxu1 %v3168_v52 }
 0x103   :  { %2047 = vmatpush1.bf16.msra.mxu0 %v3118_v44 }
 0x104   :  { %2048 = vmatprep.subr.bf16.mxu0 %v3123_v46  ;;  %2088 = vmatpush1.bf16.msra.mxu1 %v3166_v54 }
 0x105   :  { %2089 = vmatprep.subr.bf16.mxu1 %v3171_v56 }
 0x107   :  { %2049 = vmatpush2.bf16.msra.mxu0 %v3121_v48 }
 0x108   :  { %2050 = vmatprep.subr.bf16.mxu0 %v3126_v50  ;;  %2090 = vmatpush2.bf16.msra.mxu1 %v3169_v58 }
 0x109   :  { %2091 = vmatprep.subr.bf16.mxu1 %v3174_v60  ;;  %v274_v60 = vsub.s32 2, %v3403_v17 }
 0x10b   :  { %2051 = vmatpush2.bf16.msra.mxu0 %v3124_v53 }
 0x10c   :  { %2052 = vmatprep.subr.bf16.mxu0 %v3129_v55  ;;  %2092 = vmatpush2.bf16.msra.mxu1 %v3172_v62 }
 0x10d   :  { %2093 = vmatprep.subr.bf16.mxu1 %v3177_v0 }
 0x10f   :  { %2053 = vmatpush2.bf16.msra.mxu0 %v3127_v57 }
 0x110   :  { %2054 = vmatprep.subr.bf16.mxu0 %v3132_v59  ;;  %2094 = vmatpush2.bf16.msra.mxu1 %v3175_v2 }
 0x111   :  { %2095 = vmatprep.subr.bf16.mxu1 %v3180_v10 }
 0x113   :  { %2055 = vmatpush2.bf16.msra.mxu0 %v3130_v61  ;;  %v278_v61 = vsub.s32 3, %v3403_v17  ;;  %v3214_v17 = vld [vmem:[%s3511_s7 + $0x10] sm:$0xff]  }
 0x114   :  { %2056 = vmatprep.subr.bf16.mxu0 %v3135_v63  ;;  %2096 = vmatpush2.bf16.msra.mxu1 %v3178_v15  ;;  %v275_v63 = vrot.slane %v262_v35, %v274_v60 }
 0x115   :  { %2097 = vmatprep.subr.bf16.mxu1 %v3183_v20 }
 0x117   :  { %2057 = vmatpush2.bf16.msra.mxu0 %v3133_v1  ;;  %v279_v1 = vrot.slane %v262_v35, %v278_v61  ;;  %v3199_v35 = vld [vmem:[%s3509_s5 + $0x60] sm:$0xff]  }
 0x118   :  { %2058 = vmatprep.subr.bf16.mxu0 %v3138_v3  ;;  %2098 = vmatpush2.bf16.msra.mxu1 %v3181_v23 }
 0x119   :  { %2099 = vmatprep.subr.bf16.mxu1 %v3186_v26 }
 0x11b   :  { %2059 = vmatpush2.bf16.msra.mxu0 %v3136_v4 }
 0x11c   :  { %2060 = vmatprep.subr.bf16.mxu0 %v3141_v5  ;;  %2100 = vmatpush2.bf16.msra.mxu1 %v3184_v28 }
 0x11d   :  { %2101 = vmatprep.subr.bf16.mxu1 %v3189_v29 }
 0x11e   :  { %v1326_v11 = vpop.f32.mrf.mxu0 }
 0x11f   :  { %v1367_v12 = vpop.f32.mrf.mxu1  ;;  %2061 = vmatpush2.bf16.msra.mxu0 %v3139_v8  ;;  %v1327_v38 = vadd.f32 %v1326_v11, %v267_v6  ;;  %v3200_v6 = vld [vmem:[%s3509_s5 + $0x20] sm:$0xff]  }
 0x120   :  { %v1328_v18 = vpop.f32.mrf.mxu0  ;;  %2062 = vmatprep.subr.bf16.mxu0 %v3144_v9  ;;  %2102 = vmatpush2.bf16.msra.mxu1 %v3187_v31  ;;  %v3194_v31 = vld [vmem:[%s3509_s5 + $0x38] sm:$0xff]  }
 0x121   :  { %v1369_v19 = vpop.f32.mrf.mxu1  ;;  %2103 = vmatprep.subr.bf16.mxu1 %v3192_v32  ;;  %v1329_v39 = vadd.f32 %v1328_v18, %v271_v37  ;;  %v1368_v33 = vadd.f32 %v1367_v12, %v1327_v38  ;;  %v3196_v32 = vld [vmem:[%s3509_s5 + $0x30] sm:$0xff]   ;;  %v3201_v37 = vld [vmem:[%s3509_s5 + $0x58] sm:$0xff]  }
 0x122   :  { %v1330_v21 = vpop.f32.mrf.mxu0  ;;  %v3202_v38 = vld [vmem:[%s3509_s5 + $0x18] sm:$0xff]  }
 0x123   :  { %v1371_v22 = vpop.f32.mrf.mxu1  ;;  %2063 = vmatpush2.bf16.msra.mxu0 %v3142_v16  ;;  %v1370_v41 = vadd.f32 %v1369_v19, %v1329_v39  ;;  %v3203_v39 = vld [vmem:[%s3509_s5 + $0x50] sm:$0xff]  }
 0x124   :  { %v1331_v24 = vpop.f32.mrf.mxu0  ;;  %2104 = vmatpush2.bf16.msra.mxu1 %v3190_v51  ;;  %v3197_v51 = vld [vmem:[%s3509_s5 + $0x68] sm:$0xff]  }
 0x125   :  { %v1372_v25 = vpop.f32.mrf.mxu1 }
 0x127   :  { %v1449_v27 = vpop.f32.mrf.mxu1 }
 0x129   :  { %v1451_v7 = vpop.f32.mrf.mxu1 }
 0x12b   :  { %v1453_v30 = vpop.f32.mrf.mxu1 }
 0x12c   :  { %v3193_v30 = vld [vmem:[%s3509_s5 + $0x78] sm:$0xff]  }
 0x12d   :  { %v1454_v13 = vpop.f32.mrf.mxu1  ;;  %2735 = vmatprep.subr.bf16.mxu0 %v3193_v30 }
 0x12e   :  { %v3195_v13 = vld [vmem:[%s3509_s5 + $0x70] sm:$0xff]  }
 0x15e   :  { %v1408_v40 = vpop.f32.mrf.mxu0 }
 0x15f   :  { %v1409_v42 = vadd.f32 %v1408_v40, %v1368_v33  ;;  %v3204_v33 = vld [vmem:[%s3509_s5 + $0x10] sm:$0xff]   ;;  %v3205_v40 = vld [vmem:[%s3509_s5 + $0x48] sm:$0xff]  }
 0x160   :  { %v1410_v43 = vpop.f32.mrf.mxu0 }
 0x161   :  { %v1450_v44 = vadd.f32 %v1449_v27, %v1409_v42  ;;  %v1411_v45 = vadd.f32 %v1410_v43, %v1370_v41  ;;  %v3206_v41 = vld [vmem:[%s3509_s5 + $0x8] sm:$0xff]   ;;  %v3207_v42 = vld [vmem:[%s3509_s5 + $0x40] sm:$0xff]  }
 0x162   :  { %v1412_v46 = vpop.f32.mrf.mxu0  ;;  %v3208_v43 = vld [vmem:[%s3509_s5] sm:$0xff]  }
 0x163   :  { %vm1620_vm1 = vcmp.gt.f32.partialorder %v1450_v44, 0.0  ;;  %v1624_v47 = vmul.f32 0.01, %v1450_v44  ;;  %v1452_v48 = vadd.f32 %v1451_v7, %v1411_v45  ;;  %v3294_v45 = vmov 0.0   ;;  %v3210_v46 = vld [vmem:[%s3511_s7 + $0x30] sm:$0xff]  }
 0x164   :  { %v1413_v49 = vpop.f32.mrf.mxu0  ;;  %2766 = vmatprep.subr.bf16.mxu1 %v3294_v45 }
 0x165   :  { %v1625_v50 = vmul.f32 0.01, %v1452_v48  ;;  %vm1621_vm2 = vcmp.gt.f32.partialorder %v1452_v48, 0.0  ;;  %v1628_v52 = vsel %vm1620_vm1, %v1450_v44, %v1624_v47  ;;  %v3209_v44 = vld [vmem:[%s3511_s7 + $0x38] sm:$0xff]   ;;  %v3211_v47 = vld [vmem:[%s3511_s7 + $0x28] sm:$0xff]  }
 0x166   :  { %v1632_v57 = vpack.c.bf16 %v1628_v52, %v1628_v52  ;;  %v3213_v49 = vld [vmem:[%s3511_s7 + $0x18] sm:$0xff]  }
 0x167   :  { %v1490_v53 = vpop.f32.mrf.mxu1  ;;  %v1629_v54 = vsel %vm1621_vm2, %v1452_v48, %v1625_v50  ;;  %v3212_v48 = vld [vmem:[%s3511_s7 + $0x20] sm:$0xff]  }
 0x168   :  { %v1633_v56 = vpack.c.bf16 %v1629_v54, %v1629_v54  ;;  %v1491_v3 = vadd.f32 %v1490_v53, %v275_v63 }
 0x169   :  { %v1492_v55 = vpop.f32.mrf.mxu1 }
 0x16a   :  { %2064 = vmatprep.mubr.bf16.mxu0 %v1633_v56  ;;  %v1493_v5 = vadd.f32 %v1492_v55, %v279_v1  ;;  %v1700_v55 = vld [vmem:[%s3508_s4] sm:$0x3] }
 0x16b   :  { %v1494_v58 = vpop.f32.mrf.mxu1  ;;  %2065 = vmatmul.mubr.bf16.vlgmr.msra.gmra.mxu0 %v1632_v57  ;;  %v1705_v56 = vrot.slane %v1700_v55, %v266_v34  ;;  %v1709_v57 = vrot.slane %v1700_v55, %v270_v36  ;;  %v3215_v34 = vld [vmem:[%s3511_s7 + $0x8] sm:$0xff]   ;;  %v3216_v36 = vld [vmem:[%s3511_s7] sm:$0xff]  }
 0x16c   :  { %2736 = vmatpush3.bf16.msra.mxu0 %v3194_v31 }
 0x16d   :  { %v1495_v59 = vpop.f32.mrf.mxu1  ;;  %2737 = vmatprep.subr.bf16.mxu0 %v3195_v13 }
 0x170   :  { %2738 = vmatpush3.bf16.msra.mxu0 %v3196_v32 }
 0x171   :  { %2739 = vmatprep.subr.bf16.mxu0 %v3197_v51 }
 0x174   :  { %2740 = vmatpush3.bf16.msra.mxu0 %v3198_v14 }
 0x175   :  { %2741 = vmatprep.subr.bf16.mxu0 %v3199_v35 }
 0x178   :  { %2742 = vmatpush3.bf16.msra.mxu0 %v3200_v6 }
 0x179   :  { %2743 = vmatprep.subr.bf16.mxu0 %v3201_v37 }
 0x17c   :  { %2744 = vmatpush3.bf16.msra.mxu0 %v3202_v38 }
 0x17d   :  { %2745 = vmatprep.subr.bf16.mxu0 %v3203_v39 }
 0x180   :  { %2746 = vmatpush3.bf16.msra.mxu0 %v3204_v33 }
 0x181   :  { %2747 = vmatprep.subr.bf16.mxu0 %v3205_v40 }
 0x184   :  { %2748 = vmatpush3.bf16.msra.mxu0 %v3206_v41 }
 0x185   :  { %2749 = vmatprep.subr.bf16.mxu0 %v3207_v42 }
 0x188   :  { %2750 = vmatpush3.bf16.msra.mxu0 %v3208_v43 }
 0x19e   :  { %v1531_v62 = vpop.f32.mrf.mxu0 }
 0x19f   :  { %v1532_v8 = vadd.f32 %v1531_v62, %v1491_v3 }
 0x1a0   :  { %v1533_v0 = vpop.f32.mrf.mxu0 }
 0x1a1   :  { %v1534_v11 = vadd.f32 %v1533_v0, %v1493_v5 }
 0x1a2   :  { %v1535_v2 = vpop.f32.mrf.mxu0 }
 0x1a4   :  { %v1536_v4 = vpop.f32.mrf.mxu0 }
 0x1a6   :  { %v1613_v10 = vpop.f32.mrf.mxu0 }
 0x1a7   :  { %v1572_v9 = vpop.f32.mrf.mxu1 }
 0x1a8   :  { %v1573_v12 = vadd.f32 %v1572_v9, %v1532_v8  ;;  %v1615_v16 = vpop.f32.mrf.mxu0 }
 0x1a9   :  { %v1574_v15 = vpop.f32.mrf.mxu1 }
 0x1aa   :  { %v1614_v18 = vadd.f32 %v1613_v10, %v1573_v12  ;;  %v1575_v19 = vadd.f32 %v1574_v15, %v1534_v11  ;;  %v1617_v21 = vpop.f32.mrf.mxu0  ;;  %v2709_v11 = vld [vmem:[%s3510_s6] ss:$0 sm:$0xff]  ;;  %s3296_s6 = smov [#allocation7]  }
 0x1ab   :  { %v1576_v20 = vpop.f32.mrf.mxu1  ;;  %s2430_s30 = sshll.u32 %s3296_s6, 4  ;;  %s2431_s30 = int_to_ptr.vmem [resolvable:$true] %s2430_s30 }
 0x1ac   :  { %vm1622_vm3 = vcmp.gt.f32.partialorder %v1614_v18, 0.0  ;;  %v1626_v22 = vmul.f32 0.01, %v1614_v18  ;;  %v1616_v23 = vadd.f32 %v1615_v16, %v1575_v19  ;;  %v1618_v25 = vpop.f32.mrf.mxu0  ;;  %p3266_p11 = scmp.lt.s32.totalorder %s2431_s30, %s2431_s30 }
 0x1ad   :  { %v1577_v24 = vpop.f32.mrf.mxu1 }
 0x1ae   :  { %vm1623_vm4 = vcmp.gt.f32.partialorder %v1616_v23, 0.0  ;;  %v1627_v26 = vmul.f32 0.01, %v1616_v23  ;;  %v1630_v27 = vsel %vm1622_vm3, %v1614_v18, %v1626_v22 }
 0x1af   :  { %v1634_v29 = vpack.c.bf16 %v1630_v27, %v1630_v27 }
 0x1b0   :  { %v1631_v28 = vsel %vm1623_vm4, %v1616_v23, %v1627_v26  ;;  %v2726_v23 = vld [vmem:[%s3512_s8] ss:$0 sm:$0xff]  ;;  %s3261_s8 = scalar_lea.vmem %s2431_s30, 128 }
 0x1b1   :  { %v1635_v7 = vpack.c.bf16 %v1631_v28, %v1631_v28  ;;  %p3262_p10 = scmp.ne.s32.totalorder %s2431_s30, %s3261_s8  ;;  %p3267_p12 = scmp.lt.s32.totalorder %s3261_s8, %s3261_s8 }
 0x1b3   :  { %2105 = vmatprep.mubr.bf16.mxu1 %v1635_v7  ;;  %p3268_p13 = por %p3267_p12, %p3266_p11 }
 0x1b4   :  { %2106 = vmatmul.mubr.bf16.vlgmr.msra.gmra.mxu1 %v1634_v29 }
 0x1b5   :  { %2767 = vmatpush3.bf16.msra.mxu1 %v3209_v44  ;;  %2782 = vmatprep.mubr.msk.bf16.mxu1 %vm3295_vm7, %v3294_v45  ;;  %p3269_p0 = pnand %p3268_p13, %p3262_p10 }
 0x1b6   :  { %2768 = vmatprep.subr.bf16.mxu1 %v3294_v45 }
 0x1b9   :  { %2769 = vmatpush3.bf16.msra.mxu1 %v3210_v46 }
 0x1ba   :  { %2770 = vmatprep.subr.bf16.mxu1 %v3294_v45 }
 0x1bd   :  { %2771 = vmatpush3.bf16.msra.mxu1 %v3211_v47 }
 0x1be   :  { %2772 = vmatprep.subr.bf16.mxu1 %v3294_v45 }
 0x1c1   :  { %2773 = vmatpush3.bf16.msra.mxu1 %v3212_v48 }
 0x1c2   :  { %2774 = vmatprep.subr.bf16.mxu1 %v3294_v45 }
 0x1c5   :  { %2775 = vmatpush3.bf16.msra.mxu1 %v3213_v49 }
 0x1c6   :  { %2776 = vmatprep.subr.bf16.mxu1 %v3294_v45 }
 0x1c9   :  { %2777 = vmatpush3.bf16.msra.mxu1 %v3214_v17 }
 0x1ca   :  { %2778 = vmatprep.subr.bf16.mxu1 %v3294_v45 }
 0x1cd   :  { %2779 = vmatpush3.bf16.msra.mxu1 %v3215_v34 }
 0x1ce   :  { %2780 = vmatprep.subr.bf16.mxu1 %v3294_v45 }
 0x1d1   :  { %2781 = vmatpush3.bf16.msra.mxu1 %v3216_v36 }
 0x22b   :  { %v2066_v50 = vpop.f32.mrf.mxu0 }
 0x22c   :  { %v2067_v58 = vadd.f32 %v2066_v50, %v1705_v56 }
 0x22d   :  { %v2068_v52 = vpop.f32.mrf.mxu0 }
 0x22e   :  { %v2069_v60 = vadd.f32 %v2068_v52, %v1709_v57 }
 0x22f   :  { %v2070_v53 = vpop.f32.mrf.mxu0 }
 0x231   :  { %v2071_v54 = vpop.f32.mrf.mxu0 }
 0x274   :  { %v2107_v59 = vpop.f32.mrf.mxu1 }
 0x275   :  { %v2108_v61 = vadd.f32 %v2107_v59, %v2067_v58 }
 0x276   :  { %v2109_v62 = vpop.f32.mrf.mxu1 }
 0x277   :  { %vm2114_vm5 = vcmp.gt.f32.partialorder %v2108_v61, 0.0  ;;  %v2116_v63 = vmul.f32 0.01, %v2108_v61  ;;  %v2110_v0 = vadd.f32 %v2109_v62, %v2069_v60 }
 0x278   :  { %v2111_v1 = vpop.f32.mrf.mxu1 }
 0x279   :  { %vm2115_vm6 = vcmp.gt.f32.partialorder %v2110_v0, 0.0  ;;  %v2117_v2 = vmul.f32 0.01, %v2110_v0  ;;  %v2118_v3 = vsel %vm2114_vm5, %v2108_v61, %v2116_v63 }
 0x27a   :  { %v2112_v4 = vpop.f32.mrf.mxu1  ;;  %v2120_v9 = vpack.c.bf16 %v2118_v3, %v2118_v3 }
 0x27b   :  { %v2119_v5 = vsel %vm2115_vm6, %v2110_v0, %v2117_v2 }
 0x27c   :  { %v2121_v8 = vpack.c.bf16 %v2119_v5, %v2119_v5 }
 0x27e   :  { %2289 = vmatprep.mubr.bf16.mxu0 %v2121_v8 }
 0x27f   :  { %2290 = vmatmul.mubr.bf16.vlgmr.msra.gmra.mxu0 %v2120_v9 }
 0x33f   :  { %v2751_v10 = vpop.f32.mrf.mxu0 }
 0x341   :  { %v2752_v12 = vpop.f32.mrf.mxu0 }
 0x342   :  { %v2753_v15 = vadd.f32 %v2752_v12, %v2751_v10 }
 0x343   :  { %v2754_v16 = vpop.f32.mrf.mxu0 }
 0x344   :  { %v2292_v18 = vadd.f32 %v2753_v15, %v2709_v11 }
 0x345   :  { %v2755_v19 = vpop.f32.mrf.mxu0 }
 0x346   :  { %vm2297_vm8 = vcmp.gt.f32.partialorder %v2292_v18, 0.0  ;;  %v2298_v20 = vmul.f32 0.01, %v2292_v18 }
 0x348   :  { %v2299_v21 = vsel %vm2297_vm8, %v2292_v18, %v2298_v20 }
 0x349   :  { %v2300_v22 = vpack.c.bf16 %v2299_v21, %v2299_v21 }
 0x34b   :  { %2783 = vmatmul.mubr.bf16.vlgmr.msra.gmra.mxu1 %v2300_v22 }
 0x40b   :  { %v2406_v24 = vpop.f32.mrf.mxu1 }
 0x40c   :  { %v2407_v25 = vadd.f32 %v2726_v23, %v2406_v24 }
 0x40d   :  { %v2784_v26 = vpop.f32.mrf.mxu1 }
 0x40e   :  { %2412 = vmax.xlane.f32.xlu0 %v2407_v25 }
 0x40f   :  { %v2409_v27 = vpop.f32.mrf.mxu1 }
 0x411   :  { %v2785_v28 = vpop.f32.mrf.mxu1 }
 0x497   :  { %v2413_v7 = vpop.xlane.xlu0 %2412 }
 0x498   :  { %v2414_v29 = vsub.f32 %v2407_v25, %v2413_v7 }
 0x49a   :  { %v2415_v30 = vmul.f32 1.442695, %v2414_v29 }
 0x49c   :  { %3217 = vpow2.f32 %v2415_v30 }
 0x4a9   :  { %v3218_v31 = vpop.eup %3217 }
 0x4aa   :  { %2417 = vadd.xlane.f32.xlu0 %v3218_v31 }
 0x533   :  { %v2418_v13 = vpop.xlane.xlu0 %2417 }
 0x534   :  { %3219 = vlog2.f32 %v2418_v13 }
 0x541   :  { %v3220_v32 = vpop.eup %3219 }
 0x542   :  { %v2420_v51 = vmul.f32 0.6931472, %v3220_v32 }
 0x544   :  { %v2421_v14 = vadd.f32 %v2420_v51, %v2413_v7 }
 0x546   :  { %v2422_v35 = vsub.f32 %v2407_v25, %v2421_v14 }
 0x548   :  { %2423 = vst [vmem:[#allocation7] sm:$0xff] %v2422_v35 }
 0x549   :  { %3272 = shalt.err (!%p3269_p0)
}
 0x54a   :  { %2433 = dma.vmem_to_hbm [thread:$0]  %s2431_s30, 128, %s3513_s9, [#allocation4]  }
 0x54b   :  { %3285 = dma.done.wait [#allocation4], 128  }
 0x54c   :  { %3286 = vsyncadd [#allocation4], 4294967168 }
 0x54d   :  { %2437 = vsyncpa [#allocation3], 1 }
 0x54e   :  { %2438 = vsyncpa [#allocation6], 1 }
 0x54f   :  { %2439 = vsyncpa [#allocation4], 1 }

</bundles_post_ra>
